<compile_context>
chip_gen: v7x
topology: tpu7x:2x2x1
jax: 0.10.0
libtpu: 0.0.40
codegen_flags: <defaults>
</compile_context>

<pallas_src>
import jax
import jax.numpy as jnp
from jax import lax
from jax.experimental import pallas as pl
from jax.experimental.pallas import tpu as pltpu


# ----------------------------------------------------------------------------- kernel

def _make_kernel(C, H, W, PAD, Bt, is_first):
    HW = H * W
    f32 = jnp.float32

    def kernel(*refs):
        if is_first:
            (x1_ref, x2_ref,
             w1_ref, b1_ref, w2_ref, b2_ref, w3_ref, b3_ref,
             out_ref, pad_ref) = refs
        else:
            (x0_ref, x1_ref, x2_ref,
             w1_ref, b1_ref, w2_ref, b2_ref, w3_ref, b3_ref,
             w4_ref, b4_ref, out_ref, pad_ref) = refs

        # Column masks undoing the W-wraparound of the flattened H*W lane axis:
        # a +/-1 column tap must not leak into the neighbouring image row.
        col = lax.broadcasted_iota(jnp.int32, (1, HW), 1) % W
        mask_wm1 = (col != 0).astype(f32)        # tap reads (h, w-1)
        mask_wp1 = (col != W - 1).astype(f32)    # tap reads (h, w+1)

        # Zero only the halo columns (lane-aligned, fixed size); the interior is
        # always written before a conv reads it, so it is never re-zeroed.
        pad_ref[:, 0:PAD] = jnp.zeros((3 * C, PAD), f32)
        pad_ref[:, PAD + HW:PAD + HW + PAD] = jnp.zeros((3 * C, PAD), f32)

        # Hoisted weight loads (tiny, reused for every image in the batch tile).
        w1v, b1v = w1_ref[...], b1_ref[...]
        w2v, b2v = w2_ref[...], b2_ref[...]
        w3v, b3v = w3_ref[...], b3_ref[...]
        if not is_first:
            w4v, b4v = w4_ref[...], b4_ref[...]

        def conv3x3(row0, row1, wv, bv):
            # wv: (9, C, cin) folded conv+BN tap weights, bv: (C, 1) folded bias.
            # Reads scratch rows [row0:row1) through 9 lane-shifted windows and
            # accumulates (C, HW) in registers -> lane-dense result.
            acc = jnp.zeros((C, HW), f32)
            for kh in range(3):
                for kw in range(3):
                    dh, dw = kh - 1, kw - 1
                    s = PAD + dh * W + dw
                    win = pad_ref[row0:row1, s:s + HW]           # (cin, HW)
                    if dw == -1:
                        win = win * mask_wm1
                    elif dw == 1:
                        win = win * mask_wp1
                    acc = acc + jnp.dot(wv[kh * 3 + kw], win,
                                        preferred_element_type=f32)
            return acc + bv

        LO, MID, HI = 0, C, 2 * C                                # scratch channel slots

        for b in range(Bt):                                      # images per grid step
            x1 = x1_ref[b].astype(f32)                           # (C, HW)
            x2 = x2_ref[b].astype(f32)

            # --- adaptive weights: softmax over (GAP(x1), GAP(x2)) per channel ---
            g1 = jnp.mean(x1, axis=1, keepdims=True)             # (C, 1)
            g2 = jnp.mean(x2, axis=1, keepdims=True)
            m = jnp.maximum(g1, g2)
            e1 = jnp.exp(g1 - m)
            e2 = jnp.exp(g2 - m)
            inv = pl.reciprocal(e1 + e2, approx=True)            # EUP slot
            x1w = (e1 * inv) * x1
            x2w = (e2 * inv) * x2

            # --- conv1 on cat(x1w, x2w)  ->  Wr = sigmoid(relu(bn(conv))) -------
            pad_ref[MID:MID + C, PAD:PAD + HW] = x1w             # slot B
            pad_ref[HI:HI + C, PAD:PAD + HW] = x2w               # slot C
            wr = jax.nn.sigmoid(jnp.maximum(conv3x3(MID, HI + C, w1v, b1v), 0.0))

            # feat_x1 + feat_x2 == (x1w + x2w) * Wr
            feat = (x1w + x2w) * wr

            # --- conv2 on feat ---------------------------------------------------
            pad_ref[LO:LO + C, PAD:PAD + HW] = feat              # slot A
            t = jnp.maximum(conv3x3(LO, LO + C, w2v, b2v), 0.0)

            # --- conv3 on cat(t, x1w, x2w): x1w/x2w still resident in slots B/C --
            pad_ref[LO:LO + C, PAD:PAD + HW] = t                 # slot A (reuse)
            y = jnp.maximum(conv3x3(LO, HI + C, w3v, b3v), 0.0)

            if not is_first:
                x0 = x0_ref[b].astype(f32)
                # --- final conv on cat(x0, y) ------------------------------------
                pad_ref[LO:LO + C, PAD:PAD + HW] = x0            # slot A
                pad_ref[MID:MID + C, PAD:PAD + HW] = y           # slot B
                y = jnp.maximum(conv3x3(LO, MID + C, w4v, b4v), 0.0)

            out_ref[b] = y.astype(out_ref.dtype)                 # lane-dense store

    return kernel


# ----------------------------------------------------------------------------- wrapper

def _prep_kernel_params(params):
    """(OIHW folded weight, bias) -> ((9, cout, cin) tap-major weight, (cout, 1) bias)."""
    out = []
    for w, b in params:
        cout, cin = w.shape[0], w.shape[1]
        w9 = jnp.transpose(w, (2, 3, 0, 1)).reshape(9, cout, cin)      # (kh,kw,co,ci)
        out.append((jnp.asarray(w9, jnp.float32),
                    jnp.asarray(b, jnp.float32).reshape(cout, 1)))
    return out


def swfm_forward(x0, x1, x2, params, is_first=False, batch_tile=1):
    """x0, x1, x2: NCHW (PyTorch convention). Returns NCHW."""
    N, C, H, W = x1.shape
    HW = H * W
    Bt = batch_tile
    assert N % Bt == 0, "batch_tile must divide N"
    PAD = ((W + 1 + 127) // 128) * 128            # lane-aligned halo width (>= W+1)

    flat = lambda a: a.reshape(N, C, HW).astype(jnp.float32)   # free reshape, no transpose
    x1f, x2f = flat(x1), flat(x2)

    (w1, b1), (w2, b2), (w3, b3), (w4, b4) = _prep_kernel_params(params)

    img_spec = pl.BlockSpec((Bt, C, HW), lambda n: (n, 0, 0))
    w_spec = lambda a: pl.BlockSpec(a.shape, lambda n: (0, 0, 0))
    b_spec = lambda a: pl.BlockSpec(a.shape, lambda n: (0, 0))

    if is_first:
        operands = (x1f, x2f, w1, b1, w2, b2, w3, b3)
        in_specs = [img_spec, img_spec,
                    w_spec(w1), b_spec(b1), w_spec(w2), b_spec(b2),
                    w_spec(w3), b_spec(b3)]
    else:
        operands = (flat(x0), x1f, x2f, w1, b1, w2, b2, w3, b3, w4, b4)
        in_specs = [img_spec, img_spec, img_spec,
                    w_spec(w1), b_spec(b1), w_spec(w2), b_spec(b2),
                    w_spec(w3), b_spec(b3), w_spec(w4), b_spec(b4)]

    kernel = _make_kernel(C, H, W, PAD, Bt, is_first)

    out_flat = pl.pallas_call(
        kernel,
        out_shape=jax.ShapeDtypeStruct((N, C, HW), jnp.float32),
        grid_spec=pltpu.PrefetchScalarGridSpec(
            num_scalar_prefetch=0,
            grid=(N // Bt,),
            in_specs=in_specs,
            out_specs=pl.BlockSpec((Bt, C, HW), lambda n: (n, 0, 0)),
            scratch_shapes=[pltpu.VMEM((3 * C, PAD + HW + PAD), jnp.float32)],
        ),
        compiler_params=pltpu.CompilerParams(
            dimension_semantics=("parallel",)),   # batch images are independent
    )(*operands)

    return out_flat.reshape(N, C, H, W)


# ----------------------------------------------------------------------------- params

def init_params(key, C, eps=1e-5):
    """Deterministic folded conv+eval-BN params for conv1/conv2/conv3/conv (OIHW, bias)."""
    specs = [2 * C, C, 3 * C, 2 * C]              # in-channels per conv; out-channels = C
    params = []
    for i, cin in enumerate(specs):
        k = jax.random.fold_in(key, i)
        kw_, kg, kb, km, kv = jax.random.split(k, 5)
        w = jax.random.normal(kw_, (C, cin, 3, 3), jnp.float32) * 0.1     # OIHW
        gamma = 1.0 + 0.1 * jax.random.normal(kg, (C,), jnp.float32)
        beta = 0.1 * jax.random.normal(kb, (C,), jnp.float32)
        mean = 0.1 * jax.random.normal(km, (C,), jnp.float32)
        var = jnp.abs(jax.random.normal(kv, (C,), jnp.float32)) * 0.1 + 1.0
        scale = gamma / jnp.sqrt(var + eps)
        bias = beta - mean * scale
        params.append((w * scale[:, None, None, None], bias))
    return params


# ----------------------------------------------------------------------------- reference

def ref_forward(x0, x1, x2, params, is_first=False):
    def conv_bn(x_nhwc, w_oihw, b):
        w_hwio = jnp.transpose(w_oihw, (2, 3, 1, 0))
        y = lax.conv_general_dilated(x_nhwc, w_hwio, (1, 1), "SAME",
                                     dimension_numbers=("NHWC", "HWIO", "NHWC"))
        return y + b.reshape(1, 1, 1, -1)

    to_nhwc = lambda a: jnp.transpose(a, (0, 2, 3, 1)).astype(jnp.float32)
    x0n, x1n, x2n = map(to_nhwc, (x0, x1, x2))
    (w1, b1), (w2, b2), (w3, b3), (w4, b4) = params

    g1 = jnp.mean(x1n, axis=(1, 2), keepdims=True)
    g2 = jnp.mean(x2n, axis=(1, 2), keepdims=True)
    m = jnp.maximum(g1, g2)
    e1, e2 = jnp.exp(g1 - m), jnp.exp(g2 - m)
    x1w = (e1 / (e1 + e2)) * x1n
    x2w = (e2 / (e1 + e2)) * x2n

    wr = jax.nn.sigmoid(jnp.maximum(conv_bn(jnp.concatenate([x1w, x2w], -1), w1, b1), 0.0))
    feat = (x1w + x2w) * wr
    t = jnp.maximum(conv_bn(feat, w2, b2), 0.0)
    y = jnp.maximum(conv_bn(jnp.concatenate([t, x1w, x2w], -1), w3, b3), 0.0)
    if not is_first:
        y = jnp.maximum(conv_bn(jnp.concatenate([x0n, y], -1), w4, b4), 0.0)
    return jnp.transpose(y, (0, 3, 1, 2))


# ----------------------------------------------------------------------------- main

if __name__ == "__main__":
    key = jax.random.PRNGKey(0)
    N, C, H, W = 2, 4, 16, 16
    k0, k1, k2, kp = jax.random.split(key, 4)
    x0 = jax.random.normal(k0, (N, C, H, W), jnp.float32)
    x1 = jax.random.normal(k1, (N, C, H, W), jnp.float32)
    x2 = jax.random.normal(k2, (N, C, H, W), jnp.float32)
    params = init_params(kp, C)

    out = swfm_forward(x0, x1, x2, params, is_first=False, batch_tile=1)
    out = jax.block_until_ready(out)

    ref = ref_forward(x0, x1, x2, params, is_first=False)
    assert out.shape == (N, C, H, W)
    err = float(jnp.max(jnp.abs(out - ref)))
    assert jnp.allclose(out, ref, atol=1e-2, rtol=1e-2), f"max abs err {err}"

    print("KERNEL_OK")
</pallas_src>

<mosaic_0001>
module attributes {stable_mosaic.version = 11 : i64} {
  func.func @kernel(%arg0: i32, %arg1: memref<1x4x256xf32, #tpu.memory_space<vmem>>, %arg2: memref<1x4x256xf32, #tpu.memory_space<vmem>>, %arg3: memref<1x4x256xf32, #tpu.memory_space<vmem>>, %arg4: memref<9x4x8xf32, #tpu.memory_space<vmem>>, %arg5: memref<4x1xf32, #tpu.memory_space<vmem>>, %arg6: memref<9x4x4xf32, #tpu.memory_space<vmem>>, %arg7: memref<4x1xf32, #tpu.memory_space<vmem>>, %arg8: memref<9x4x12xf32, #tpu.memory_space<vmem>>, %arg9: memref<4x1xf32, #tpu.memory_space<vmem>>, %arg10: memref<9x4x8xf32, #tpu.memory_space<vmem>>, %arg11: memref<4x1xf32, #tpu.memory_space<vmem>>, %arg12: memref<1x4x256xf32, #tpu.memory_space<vmem>>, %arg13: memref<12x512xf32, #tpu.memory_space<vmem>>) attributes {dimension_semantics = [#tpu.dimension_semantics<parallel>], iteration_bounds = array<i64: 2>, scalar_prefetch = 0 : i64, scratch_operands = 1 : i64, tpu.core_type = #tpu.core_type<tc>, window_params = [{transform_indices = @transform_0, window_bounds = array<i64: 1, 4, 256>}, {transform_indices = @transform_1, window_bounds = array<i64: 1, 4, 256>}, {transform_indices = @transform_2, window_bounds = array<i64: 1, 4, 256>}, {pipeline_mode = #tpu.pipeline_mode<synchronous>, transform_indices = @transform_3, window_bounds = array<i64: 9, 4, 8>}, {pipeline_mode = #tpu.pipeline_mode<synchronous>, transform_indices = @transform_4, window_bounds = array<i64: 4, 1>}, {pipeline_mode = #tpu.pipeline_mode<synchronous>, transform_indices = @transform_5, window_bounds = array<i64: 9, 4, 4>}, {pipeline_mode = #tpu.pipeline_mode<synchronous>, transform_indices = @transform_6, window_bounds = array<i64: 4, 1>}, {pipeline_mode = #tpu.pipeline_mode<synchronous>, transform_indices = @transform_7, window_bounds = array<i64: 9, 4, 12>}, {pipeline_mode = #tpu.pipeline_mode<synchronous>, transform_indices = @transform_8, window_bounds = array<i64: 4, 1>}, {pipeline_mode = #tpu.pipeline_mode<synchronous>, transform_indices = @transform_9, window_bounds = array<i64: 9, 4, 8>}, {pipeline_mode = #tpu.pipeline_mode<synchronous>, transform_indices = @transform_10, window_bounds = array<i64: 4, 1>}, {transform_indices = @transform_11, window_bounds = array<i64: 1, 4, 256>}]} {
    %0 = tpu.iota {dimensions = array<i32: 1>} : vector<1x256xi32>
    %c16_i32 = arith.constant 16 : i32
    %c0_i32 = arith.constant 0 : i32
    %1 = arith.cmpi eq, %c16_i32, %c0_i32 : i32
    %c1_i32 = arith.constant 1 : i32
    %2 = arith.select %1, %c1_i32, %c16_i32 : i32
    %3 = vector.broadcast %2 : i32 to vector<1x256xi32>
    %4 = arith.remsi %0, %3 : vector<1x256xi32>
    %c0_i32_0 = arith.constant 0 : i32
    %5 = vector.broadcast %c0_i32_0 : i32 to vector<1x256xi32>
    %6 = arith.cmpi ne, %4, %5 : vector<1x256xi32>
    %c0_i32_1 = arith.constant 0 : i32
    %7 = vector.broadcast %c0_i32_1 : i32 to vector<1x256xi32>
    %8 = arith.cmpi slt, %4, %7 : vector<1x256xi32>
    %c0_i32_2 = arith.constant 0 : i32
    %9 = arith.cmpi slt, %2, %c0_i32_2 : i32
    %10 = vector.broadcast %9 : i1 to vector<1x256xi1>
    %11 = vector.broadcast %10 : vector<1x256xi1> to vector<1x256xi1>
    %12 = arith.xori %8, %11 : vector<1x256xi1>
    %13 = arith.andi %12, %6 : vector<1x256xi1>
    %14 = vector.broadcast %2 : i32 to vector<1x256xi32>
    %15 = arith.addi %4, %14 : vector<1x256xi32>
    %16 = arith.select %13, %15, %4 : vector<1x256xi1>, vector<1x256xi32>
    %c0_i32_3 = arith.constant 0 : i32
    %17 = vector.broadcast %c0_i32_3 : i32 to vector<1x256xi32>
    %18 = arith.cmpi ne, %16, %17 : vector<1x256xi32>
    %19 = arith.extui %18 : vector<1x256xi1> to vector<1x256xi32>
    %20 = arith.sitofp %19 : vector<1x256xi32> to vector<1x256xf32>
    %c15_i32 = arith.constant 15 : i32
    %21 = vector.broadcast %c15_i32 : i32 to vector<1x256xi32>
    %22 = arith.cmpi ne, %16, %21 : vector<1x256xi32>
    %23 = arith.extui %22 : vector<1x256xi1> to vector<1x256xi32>
    %24 = arith.sitofp %23 : vector<1x256xi32> to vector<1x256xf32>
    %cst = arith.constant 0.000000e+00 : f32
    %25 = vector.broadcast %cst : f32 to vector<12x128xf32>
    %c0 = arith.constant 0 : index
    %c0_4 = arith.constant 0 : index
    %26 = vector.load %arg13[%c0, %c0_4] : memref<12x512xf32, #tpu.memory_space<vmem>>, vector<12x128xf32>
    tpu.vector_store %arg13[%c0, %c0_4], %25 {strides = array<i32>} : memref<12x512xf32, #tpu.memory_space<vmem>>, vector<12x128xf32>,
    %cst_5 = arith.constant 0.000000e+00 : f32
    %27 = vector.broadcast %cst_5 : f32 to vector<12x128xf32>
    %c0_6 = arith.constant 0 : index
    %c384 = arith.constant 384 : index
    %28 = vector.load %arg13[%c0_6, %c384] : memref<12x512xf32, #tpu.memory_space<vmem>>, vector<12x128xf32>
    tpu.vector_store %arg13[%c0_6, %c384], %27 {strides = array<i32>} : memref<12x512xf32, #tpu.memory_space<vmem>>, vector<12x128xf32>,
    %c0_7 = arith.constant 0 : index
    %c0_8 = arith.constant 0 : index
    %c0_9 = arith.constant 0 : index
    %29 = vector.load %arg4[%c0_7, %c0_8, %c0_9] : memref<9x4x8xf32, #tpu.memory_space<vmem>>, vector<9x4x8xf32>
    %c0_10 = arith.constant 0 : index
    %c0_11 = arith.constant 0 : index
    %30 = vector.load %arg5[%c0_10, %c0_11] : memref<4x1xf32, #tpu.memory_space<vmem>>, vector<4x1xf32>
    %c0_12 = arith.constant 0 : index
    %c0_13 = arith.constant 0 : index
    %c0_14 = arith.constant 0 : index
    %31 = vector.load %arg6[%c0_12, %c0_13, %c0_14] : memref<9x4x4xf32, #tpu.memory_space<vmem>>, vector<9x4x4xf32>
    %c0_15 = arith.constant 0 : index
    %c0_16 = arith.constant 0 : index
    %32 = vector.load %arg7[%c0_15, %c0_16] : memref<4x1xf32, #tpu.memory_space<vmem>>, vector<4x1xf32>
    %c0_17 = arith.constant 0 : index
    %c0_18 = arith.constant 0 : index
    %c0_19 = arith.constant 0 : index
    %33 = vector.load %arg8[%c0_17, %c0_18, %c0_19] : memref<9x4x12xf32, #tpu.memory_space<vmem>>, vector<9x4x12xf32>
    %c0_20 = arith.constant 0 : index
    %c0_21 = arith.constant 0 : index
    %34 = vector.load %arg9[%c0_20, %c0_21] : memref<4x1xf32, #tpu.memory_space<vmem>>, vector<4x1xf32>
    %c0_22 = arith.constant 0 : index
    %c0_23 = arith.constant 0 : index
    %c0_24 = arith.constant 0 : index
    %35 = vector.load %arg10[%c0_22, %c0_23, %c0_24] : memref<9x4x8xf32, #tpu.memory_space<vmem>>, vector<9x4x8xf32>
    %c0_25 = arith.constant 0 : index
    %c0_26 = arith.constant 0 : index
    %36 = vector.load %arg11[%c0_25, %c0_26] : memref<4x1xf32, #tpu.memory_space<vmem>>, vector<4x1xf32>
    %c0_27 = arith.constant 0 : index
    %c0_28 = arith.constant 0 : index
    %c0_29 = arith.constant 0 : index
    %37 = vector.load %arg2[%c0_27, %c0_28, %c0_29] : memref<1x4x256xf32, #tpu.memory_space<vmem>>, vector<1x4x256xf32>
    %38 = vector.shape_cast %37 : vector<1x4x256xf32> to vector<4x256xf32>
    %c0_30 = arith.constant 0 : index
    %c0_31 = arith.constant 0 : index
    %c0_32 = arith.constant 0 : index
    %39 = vector.load %arg3[%c0_30, %c0_31, %c0_32] : memref<1x4x256xf32, #tpu.memory_space<vmem>>, vector<1x4x256xf32>
    %40 = vector.shape_cast %39 : vector<1x4x256xf32> to vector<4x256xf32>
    %cst_33 = arith.constant dense<0.000000e+00> : vector<4xf32>
    %41 = vector.multi_reduction <add>, %38, %cst_33 [1] : vector<4x256xf32> to vector<4xf32>
    %42 = vector.shape_cast %41 : vector<4xf32> to vector<4x1xf32>
    %cst_34 = arith.constant 2.560000e+02 : f32
    %43 = vector.broadcast %cst_34 : f32 to vector<4x1xf32>
    %44 = arith.divf %42, %43 : vector<4x1xf32>
    %cst_35 = arith.constant dense<0.000000e+00> : vector<4xf32>
    %45 = vector.multi_reduction <add>, %40, %cst_35 [1] : vector<4x256xf32> to vector<4xf32>
    %46 = vector.shape_cast %45 : vector<4xf32> to vector<4x1xf32>
    %cst_36 = arith.constant 2.560000e+02 : f32
    %47 = vector.broadcast %cst_36 : f32 to vector<4x1xf32>
    %48 = arith.divf %46, %47 : vector<4x1xf32>
    %49 = arith.maximumf %44, %48 : vector<4x1xf32>
    %50 = arith.subf %44, %49 : vector<4x1xf32>
    %51 = math.exp %50 : vector<4x1xf32>
    %52 = arith.subf %48, %49 : vector<4x1xf32>
    %53 = math.exp %52 : vector<4x1xf32>
    %54 = arith.addf %51, %53 : vector<4x1xf32>
    %55 = tpu.reciprocal %54 {approx = true} : vector<4x1xf32> -> vector<4x1xf32>
    %56 = arith.mulf %51, %55 : vector<4x1xf32>
    %57 = vector.broadcast %56 : vector<4x1xf32> to vector<4x256xf32>
    %58 = arith.mulf %57, %38 : vector<4x256xf32>
    %59 = arith.mulf %53, %55 : vector<4x1xf32>
    %60 = vector.broadcast %59 : vector<4x1xf32> to vector<4x256xf32>
    %61 = arith.mulf %60, %40 : vector<4x256xf32>
    %c4 = arith.constant 4 : index
    %c128 = arith.constant 128 : index
    %62 = vector.load %arg13[%c4, %c128] : memref<12x512xf32, #tpu.memory_space<vmem>>, vector<4x256xf32>
    tpu.vector_store %arg13[%c4, %c128], %58 {strides = array<i32>} : memref<12x512xf32, #tpu.memory_space<vmem>>, vector<4x256xf32>,
    %c8 = arith.constant 8 : index
    %c128_37 = arith.constant 128 : index
    %63 = vector.load %arg13[%c8, %c128_37] : memref<12x512xf32, #tpu.memory_space<vmem>>, vector<4x256xf32>
    tpu.vector_store %arg13[%c8, %c128_37], %61 {strides = array<i32>} : memref<12x512xf32, #tpu.memory_space<vmem>>, vector<4x256xf32>,
    %cst_38 = arith.constant 0.000000e+00 : f32
    %64 = vector.broadcast %cst_38 : f32 to vector<4x256xf32>
    %c4_39 = arith.constant 4 : index
    %c111 = arith.constant 111 : index
    %65 = vector.load %arg13[%c4_39, %c111] : memref<12x512xf32, #tpu.memory_space<vmem>>, vector<8x256xf32>
    %66 = vector.broadcast %20 : vector<1x256xf32> to vector<8x256xf32>
    %67 = arith.mulf %65, %66 : vector<8x256xf32>
    %68 = vector.extract_strided_slice %29 {offsets = [0, 0, 0], sizes = [1, 4, 8], strides = [1, 1, 1]} : vector<9x4x8xf32> to vector<1x4x8xf32>
    %69 = vector.shape_cast %68 : vector<1x4x8xf32> to vector<4x8xf32>
    %cst_40 = arith.constant dense<0.000000e+00> : vector<4x256xf32>
    %70 = tpu.matmul %69, %67, %cst_40 {dimension_numbers = #tpu.dot_dimension_numbers<[1], [0], [0], [1], [0, 0, 1, 1], [], []>} : vector<4x8xf32>, vector<8x256xf32>, vector<4x256xf32> -> vector<4x256xf32>
    %71 = arith.addf %64, %70 : vector<4x256xf32>
    %c4_41 = arith.constant 4 : index
    %c112 = arith.constant 112 : index
    %72 = vector.load %arg13[%c4_41, %c112] : memref<12x512xf32, #tpu.memory_space<vmem>>, vector<8x256xf32>
    %73 = vector.extract_strided_slice %29 {offsets = [1, 0, 0], sizes = [1, 4, 8], strides = [1, 1, 1]} : vector<9x4x8xf32> to vector<1x4x8xf32>
    %74 = vector.shape_cast %73 : vector<1x4x8xf32> to vector<4x8xf32>
    %cst_42 = arith.constant dense<0.000000e+00> : vector<4x256xf32>
    %75 = tpu.matmul %74, %72, %cst_42 {dimension_numbers = #tpu.dot_dimension_numbers<[1], [0], [0], [1], [0, 0, 1, 1], [], []>} : vector<4x8xf32>, vector<8x256xf32>, vector<4x256xf32> -> vector<4x256xf32>
    %76 = arith.addf %71, %75 : vector<4x256xf32>
    %c4_43 = arith.constant 4 : index
    %c113 = arith.constant 113 : index
    %77 = vector.load %arg13[%c4_43, %c113] : memref<12x512xf32, #tpu.memory_space<vmem>>, vector<8x256xf32>
    %78 = vector.broadcast %24 : vector<1x256xf32> to vector<8x256xf32>
    %79 = arith.mulf %77, %78 : vector<8x256xf32>
    %80 = vector.extract_strided_slice %29 {offsets = [2, 0, 0], sizes = [1, 4, 8], strides = [1, 1, 1]} : vector<9x4x8xf32> to vector<1x4x8xf32>
    %81 = vector.shape_cast %80 : vector<1x4x8xf32> to vector<4x8xf32>
    %cst_44 = arith.constant dense<0.000000e+00> : vector<4x256xf32>
    %82 = tpu.matmul %81, %79, %cst_44 {dimension_numbers = #tpu.dot_dimension_numbers<[1], [0], [0], [1], [0, 0, 1, 1], [], []>} : vector<4x8xf32>, vector<8x256xf32>, vector<4x256xf32> -> vector<4x256xf32>
    %83 = arith.addf %76, %82 : vector<4x256xf32>
    %c4_45 = arith.constant 4 : index
    %c127 = arith.constant 127 : index
    %84 = vector.load %arg13[%c4_45, %c127] : memref<12x512xf32, #tpu.memory_space<vmem>>, vector<8x256xf32>
    %85 = vector.broadcast %20 : vector<1x256xf32> to vector<8x256xf32>
    %86 = arith.mulf %84, %85 : vector<8x256xf32>
    %87 = vector.extract_strided_slice %29 {offsets = [3, 0, 0], sizes = [1, 4, 8], strides = [1, 1, 1]} : vector<9x4x8xf32> to vector<1x4x8xf32>
    %88 = vector.shape_cast %87 : vector<1x4x8xf32> to vector<4x8xf32>
    %cst_46 = arith.constant dense<0.000000e+00> : vector<4x256xf32>
    %89 = tpu.matmul %88, %86, %cst_46 {dimension_numbers = #tpu.dot_dimension_numbers<[1], [0], [0], [1], [0, 0, 1, 1], [], []>} : vector<4x8xf32>, vector<8x256xf32>, vector<4x256xf32> -> vector<4x256xf32>
    %90 = arith.addf %83, %89 : vector<4x256xf32>
    %c4_47 = arith.constant 4 : index
    %c128_48 = arith.constant 128 : index
    %91 = vector.load %arg13[%c4_47, %c128_48] : memref<12x512xf32, #tpu.memory_space<vmem>>, vector<8x256xf32>
    %92 = vector.extract_strided_slice %29 {offsets = [4, 0, 0], sizes = [1, 4, 8], strides = [1, 1, 1]} : vector<9x4x8xf32> to vector<1x4x8xf32>
    %93 = vector.shape_cast %92 : vector<1x4x8xf32> to vector<4x8xf32>
    %cst_49 = arith.constant dense<0.000000e+00> : vector<4x256xf32>
    %94 = tpu.matmul %93, %91, %cst_49 {dimension_numbers = #tpu.dot_dimension_numbers<[1], [0], [0], [1], [0, 0, 1, 1], [], []>} : vector<4x8xf32>, vector<8x256xf32>, vector<4x256xf32> -> vector<4x256xf32>
    %95 = arith.addf %90, %94 : vector<4x256xf32>
    %c4_50 = arith.constant 4 : index
    %c129 = arith.constant 129 : index
    %96 = vector.load %arg13[%c4_50, %c129] : memref<12x512xf32, #tpu.memory_space<vmem>>, vector<8x256xf32>
    %97 = vector.broadcast %24 : vector<1x256xf32> to vector<8x256xf32>
    %98 = arith.mulf %96, %97 : vector<8x256xf32>
    %99 = vector.extract_strided_slice %29 {offsets = [5, 0, 0], sizes = [1, 4, 8], strides = [1, 1, 1]} : vector<9x4x8xf32> to vector<1x4x8xf32>
    %100 = vector.shape_cast %99 : vector<1x4x8xf32> to vector<4x8xf32>
    %cst_51 = arith.constant dense<0.000000e+00> : vector<4x256xf32>
    %101 = tpu.matmul %100, %98, %cst_51 {dimension_numbers = #tpu.dot_dimension_numbers<[1], [0], [0], [1], [0, 0, 1, 1], [], []>} : vector<4x8xf32>, vector<8x256xf32>, vector<4x256xf32> -> vector<4x256xf32>
    %102 = arith.addf %95, %101 : vector<4x256xf32>
    %c4_52 = arith.constant 4 : index
    %c143 = arith.constant 143 : index
    %103 = vector.load %arg13[%c4_52, %c143] : memref<12x512xf32, #tpu.memory_space<vmem>>, vector<8x256xf32>
    %104 = vector.broadcast %20 : vector<1x256xf32> to vector<8x256xf32>
    %105 = arith.mulf %103, %104 : vector<8x256xf32>
    %106 = vector.extract_strided_slice %29 {offsets = [6, 0, 0], sizes = [1, 4, 8], strides = [1, 1, 1]} : vector<9x4x8xf32> to vector<1x4x8xf32>
    %107 = vector.shape_cast %106 : vector<1x4x8xf32> to vector<4x8xf32>
    %cst_53 = arith.constant dense<0.000000e+00> : vector<4x256xf32>
    %108 = tpu.matmul %107, %105, %cst_53 {dimension_numbers = #tpu.dot_dimension_numbers<[1], [0], [0], [1], [0, 0, 1, 1], [], []>} : vector<4x8xf32>, vector<8x256xf32>, vector<4x256xf32> -> vector<4x256xf32>
    %109 = arith.addf %102, %108 : vector<4x256xf32>
    %c4_54 = arith.constant 4 : index
    %c144 = arith.constant 144 : index
    %110 = vector.load %arg13[%c4_54, %c144] : memref<12x512xf32, #tpu.memory_space<vmem>>, vector<8x256xf32>
    %111 = vector.extract_strided_slice %29 {offsets = [7, 0, 0], sizes = [1, 4, 8], strides = [1, 1, 1]} : vector<9x4x8xf32> to vector<1x4x8xf32>
    %112 = vector.shape_cast %111 : vector<1x4x8xf32> to vector<4x8xf32>
    %cst_55 = arith.constant dense<0.000000e+00> : vector<4x256xf32>
    %113 = tpu.matmul %112, %110, %cst_55 {dimension_numbers = #tpu.dot_dimension_numbers<[1], [0], [0], [1], [0, 0, 1, 1], [], []>} : vector<4x8xf32>, vector<8x256xf32>, vector<4x256xf32> -> vector<4x256xf32>
    %114 = arith.addf %109, %113 : vector<4x256xf32>
    %c4_56 = arith.constant 4 : index
    %c145 = arith.constant 145 : index
    %115 = vector.load %arg13[%c4_56, %c145] : memref<12x512xf32, #tpu.memory_space<vmem>>, vector<8x256xf32>
    %116 = vector.broadcast %24 : vector<1x256xf32> to vector<8x256xf32>
    %117 = arith.mulf %115, %116 : vector<8x256xf32>
    %118 = vector.extract_strided_slice %29 {offsets = [8, 0, 0], sizes = [1, 4, 8], strides = [1, 1, 1]} : vector<9x4x8xf32> to vector<1x4x8xf32>
    %119 = vector.shape_cast %118 : vector<1x4x8xf32> to vector<4x8xf32>
    %cst_57 = arith.constant dense<0.000000e+00> : vector<4x256xf32>
    %120 = tpu.matmul %119, %117, %cst_57 {dimension_numbers = #tpu.dot_dimension_numbers<[1], [0], [0], [1], [0, 0, 1, 1], [], []>} : vector<4x8xf32>, vector<8x256xf32>, vector<4x256xf32> -> vector<4x256xf32>
    %121 = arith.addf %114, %120 : vector<4x256xf32>
    %122 = vector.broadcast %30 : vector<4x1xf32> to vector<4x256xf32>
    %123 = arith.addf %121, %122 : vector<4x256xf32>
    %cst_58 = arith.constant 0.000000e+00 : f32
    %124 = vector.broadcast %cst_58 : f32 to vector<4x256xf32>
    %125 = arith.maximumf %123, %124 : vector<4x256xf32>
    %126 = arith.negf %125 : vector<4x256xf32>
    %127 = math.exp %126 : vector<4x256xf32>
    %cst_59 = arith.constant 1.000000e+00 : f32
    %128 = vector.broadcast %cst_59 : f32 to vector<4x256xf32>
    %129 = arith.addf %128, %127 : vector<4x256xf32>
    %130 = arith.divf %128, %129 : vector<4x256xf32>
    %131 = arith.addf %58, %61 : vector<4x256xf32>
    %132 = arith.mulf %131, %130 : vector<4x256xf32>
    %c0_60 = arith.constant 0 : index
    %c128_61 = arith.constant 128 : index
    %133 = vector.load %arg13[%c0_60, %c128_61] : memref<12x512xf32, #tpu.memory_space<vmem>>, vector<4x256xf32>
    tpu.vector_store %arg13[%c0_60, %c128_61], %132 {strides = array<i32>} : memref<12x512xf32, #tpu.memory_space<vmem>>, vector<4x256xf32>,
    %cst_62 = arith.constant 0.000000e+00 : f32
    %134 = vector.broadcast %cst_62 : f32 to vector<4x256xf32>
    %c0_63 = arith.constant 0 : index
    %c111_64 = arith.constant 111 : index
    %135 = vector.load %arg13[%c0_63, %c111_64] : memref<12x512xf32, #tpu.memory_space<vmem>>, vector<4x256xf32>
    %136 = vector.broadcast %20 : vector<1x256xf32> to vector<4x256xf32>
    %137 = arith.mulf %135, %136 : vector<4x256xf32>
    %138 = vector.extract_strided_slice %31 {offsets = [0, 0, 0], sizes = [1, 4, 4], strides = [1, 1, 1]} : vector<9x4x4xf32> to vector<1x4x4xf32>
    %139 = vector.shape_cast %138 : vector<1x4x4xf32> to vector<4x4xf32>
    %cst_65 = arith.constant dense<0.000000e+00> : vector<4x256xf32>
    %140 = tpu.matmul %139, %137, %cst_65 {dimension_numbers = #tpu.dot_dimension_numbers<[1], [0], [0], [1], [0, 0, 1, 1], [], []>} : vector<4x4xf32>, vector<4x256xf32>, vector<4x256xf32> -> vector<4x256xf32>
    %141 = arith.addf %134, %140 : vector<4x256xf32>
    %c0_66 = arith.constant 0 : index
    %c112_67 = arith.constant 112 : index
    %142 = vector.load %arg13[%c0_66, %c112_67] : memref<12x512xf32, #tpu.memory_space<vmem>>, vector<4x256xf32>
    %143 = vector.extract_strided_slice %31 {offsets = [1, 0, 0], sizes = [1, 4, 4], strides = [1, 1, 1]} : vector<9x4x4xf32> to vector<1x4x4xf32>
    %144 = vector.shape_cast %143 : vector<1x4x4xf32> to vector<4x4xf32>
    %cst_68 = arith.constant dense<0.000000e+00> : vector<4x256xf32>
    %145 = tpu.matmul %144, %142, %cst_68 {dimension_numbers = #tpu.dot_dimension_numbers<[1], [0], [0], [1], [0, 0, 1, 1], [], []>} : vector<4x4xf32>, vector<4x256xf32>, vector<4x256xf32> -> vector<4x256xf32>
    %146 = arith.addf %141, %145 : vector<4x256xf32>
    %c0_69 = arith.constant 0 : index
    %c113_70 = arith.constant 113 : index
    %147 = vector.load %arg13[%c0_69, %c113_70] : memref<12x512xf32, #tpu.memory_space<vmem>>, vector<4x256xf32>
    %148 = vector.broadcast %24 : vector<1x256xf32> to vector<4x256xf32>
    %149 = arith.mulf %147, %148 : vector<4x256xf32>
    %150 = vector.extract_strided_slice %31 {offsets = [2, 0, 0], sizes = [1, 4, 4], strides = [1, 1, 1]} : vector<9x4x4xf32> to vector<1x4x4xf32>
    %151 = vector.shape_cast %150 : vector<1x4x4xf32> to vector<4x4xf32>
    %cst_71 = arith.constant dense<0.000000e+00> : vector<4x256xf32>
    %152 = tpu.matmul %151, %149, %cst_71 {dimension_numbers = #tpu.dot_dimension_numbers<[1], [0], [0], [1], [0, 0, 1, 1], [], []>} : vector<4x4xf32>, vector<4x256xf32>, vector<4x256xf32> -> vector<4x256xf32>
    %153 = arith.addf %146, %152 : vector<4x256xf32>
    %c0_72 = arith.constant 0 : index
    %c127_73 = arith.constant 127 : index
    %154 = vector.load %arg13[%c0_72, %c127_73] : memref<12x512xf32, #tpu.memory_space<vmem>>, vector<4x256xf32>
    %155 = vector.broadcast %20 : vector<1x256xf32> to vector<4x256xf32>
    %156 = arith.mulf %154, %155 : vector<4x256xf32>
    %157 = vector.extract_strided_slice %31 {offsets = [3, 0, 0], sizes = [1, 4, 4], strides = [1, 1, 1]} : vector<9x4x4xf32> to vector<1x4x4xf32>
    %158 = vector.shape_cast %157 : vector<1x4x4xf32> to vector<4x4xf32>
    %cst_74 = arith.constant dense<0.000000e+00> : vector<4x256xf32>
    %159 = tpu.matmul %158, %156, %cst_74 {dimension_numbers = #tpu.dot_dimension_numbers<[1], [0], [0], [1], [0, 0, 1, 1], [], []>} : vector<4x4xf32>, vector<4x256xf32>, vector<4x256xf32> -> vector<4x256xf32>
    %160 = arith.addf %153, %159 : vector<4x256xf32>
    %c0_75 = arith.constant 0 : index
    %c128_76 = arith.constant 128 : index
    %161 = vector.load %arg13[%c0_75, %c128_76] : memref<12x512xf32, #tpu.memory_space<vmem>>, vector<4x256xf32>
    %162 = vector.extract_strided_slice %31 {offsets = [4, 0, 0], sizes = [1, 4, 4], strides = [1, 1, 1]} : vector<9x4x4xf32> to vector<1x4x4xf32>
    %163 = vector.shape_cast %162 : vector<1x4x4xf32> to vector<4x4xf32>
    %cst_77 = arith.constant dense<0.000000e+00> : vector<4x256xf32>
    %164 = tpu.matmul %163, %161, %cst_77 {dimension_numbers = #tpu.dot_dimension_numbers<[1], [0], [0], [1], [0, 0, 1, 1], [], []>} : vector<4x4xf32>, vector<4x256xf32>, vector<4x256xf32> -> vector<4x256xf32>
    %165 = arith.addf %160, %164 : vector<4x256xf32>
    %c0_78 = arith.constant 0 : index
    %c129_79 = arith.constant 129 : index
    %166 = vector.load %arg13[%c0_78, %c129_79] : memref<12x512xf32, #tpu.memory_space<vmem>>, vector<4x256xf32>
    %167 = vector.broadcast %24 : vector<1x256xf32> to vector<4x256xf32>
    %168 = arith.mulf %166, %167 : vector<4x256xf32>
    %169 = vector.extract_strided_slice %31 {offsets = [5, 0, 0], sizes = [1, 4, 4], strides = [1, 1, 1]} : vector<9x4x4xf32> to vector<1x4x4xf32>
    %170 = vector.shape_cast %169 : vector<1x4x4xf32> to vector<4x4xf32>
    %cst_80 = arith.constant dense<0.000000e+00> : vector<4x256xf32>
    %171 = tpu.matmul %170, %168, %cst_80 {dimension_numbers = #tpu.dot_dimension_numbers<[1], [0], [0], [1], [0, 0, 1, 1], [], []>} : vector<4x4xf32>, vector<4x256xf32>, vector<4x256xf32> -> vector<4x256xf32>
    %172 = arith.addf %165, %171 : vector<4x256xf32>
    %c0_81 = arith.constant 0 : index
    %c143_82 = arith.constant 143 : index
    %173 = vector.load %arg13[%c0_81, %c143_82] : memref<12x512xf32, #tpu.memory_space<vmem>>, vector<4x256xf32>
    %174 = vector.broadcast %20 : vector<1x256xf32> to vector<4x256xf32>
    %175 = arith.mulf %173, %174 : vector<4x256xf32>
    %176 = vector.extract_strided_slice %31 {offsets = [6, 0, 0], sizes = [1, 4, 4], strides = [1, 1, 1]} : vector<9x4x4xf32> to vector<1x4x4xf32>
    %177 = vector.shape_cast %176 : vector<1x4x4xf32> to vector<4x4xf32>
    %cst_83 = arith.constant dense<0.000000e+00> : vector<4x256xf32>
    %178 = tpu.matmul %177, %175, %cst_83 {dimension_numbers = #tpu.dot_dimension_numbers<[1], [0], [0], [1], [0, 0, 1, 1], [], []>} : vector<4x4xf32>, vector<4x256xf32>, vector<4x256xf32> -> vector<4x256xf32>
    %179 = arith.addf %172, %178 : vector<4x256xf32>
    %c0_84 = arith.constant 0 : index
    %c144_85 = arith.constant 144 : index
    %180 = vector.load %arg13[%c0_84, %c144_85] : memref<12x512xf32, #tpu.memory_space<vmem>>, vector<4x256xf32>
    %181 = vector.extract_strided_slice %31 {offsets = [7, 0, 0], sizes = [1, 4, 4], strides = [1, 1, 1]} : vector<9x4x4xf32> to vector<1x4x4xf32>
    %182 = vector.shape_cast %181 : vector<1x4x4xf32> to vector<4x4xf32>
    %cst_86 = arith.constant dense<0.000000e+00> : vector<4x256xf32>
    %183 = tpu.matmul %182, %180, %cst_86 {dimension_numbers = #tpu.dot_dimension_numbers<[1], [0], [0], [1], [0, 0, 1, 1], [], []>} : vector<4x4xf32>, vector<4x256xf32>, vector<4x256xf32> -> vector<4x256xf32>
    %184 = arith.addf %179, %183 : vector<4x256xf32>
    %c0_87 = arith.constant 0 : index
    %c145_88 = arith.constant 145 : index
    %185 = vector.load %arg13[%c0_87, %c145_88] : memref<12x512xf32, #tpu.memory_space<vmem>>, vector<4x256xf32>
    %186 = vector.broadcast %24 : vector<1x256xf32> to vector<4x256xf32>
    %187 = arith.mulf %185, %186 : vector<4x256xf32>
    %188 = vector.extract_strided_slice %31 {offsets = [8, 0, 0], sizes = [1, 4, 4], strides = [1, 1, 1]} : vector<9x4x4xf32> to vector<1x4x4xf32>
    %189 = vector.shape_cast %188 : vector<1x4x4xf32> to vector<4x4xf32>
    %cst_89 = arith.constant dense<0.000000e+00> : vector<4x256xf32>
    %190 = tpu.matmul %189, %187, %cst_89 {dimension_numbers = #tpu.dot_dimension_numbers<[1], [0], [0], [1], [0, 0, 1, 1], [], []>} : vector<4x4xf32>, vector<4x256xf32>, vector<4x256xf32> -> vector<4x256xf32>
    %191 = arith.addf %184, %190 : vector<4x256xf32>
    %192 = vector.broadcast %32 : vector<4x1xf32> to vector<4x256xf32>
    %193 = arith.addf %191, %192 : vector<4x256xf32>
    %cst_90 = arith.constant 0.000000e+00 : f32
    %194 = vector.broadcast %cst_90 : f32 to vector<4x256xf32>
    %195 = arith.maximumf %193, %194 : vector<4x256xf32>
    %c0_91 = arith.constant 0 : index
    %c128_92 = arith.constant 128 : index
    %196 = vector.load %arg13[%c0_91, %c128_92] : memref<12x512xf32, #tpu.memory_space<vmem>>, vector<4x256xf32>
    tpu.vector_store %arg13[%c0_91, %c128_92], %195 {strides = array<i32>} : memref<12x512xf32, #tpu.memory_space<vmem>>, vector<4x256xf32>,
    %cst_93 = arith.constant 0.000000e+00 : f32
    %197 = vector.broadcast %cst_93 : f32 to vector<4x256xf32>
    %c0_94 = arith.constant 0 : index
    %c111_95 = arith.constant 111 : index
    %198 = vector.load %arg13[%c0_94, %c111_95] : memref<12x512xf32, #tpu.memory_space<vmem>>, vector<12x256xf32>
    %199 = vector.broadcast %20 : vector<1x256xf32> to vector<12x256xf32>
    %200 = arith.mulf %198, %199 : vector<12x256xf32>
    %201 = vector.extract_strided_slice %33 {offsets = [0, 0, 0], sizes = [1, 4, 12], strides = [1, 1, 1]} : vector<9x4x12xf32> to vector<1x4x12xf32>
    %202 = vector.shape_cast %201 : vector<1x4x12xf32> to vector<4x12xf32>
    %cst_96 = arith.constant dense<0.000000e+00> : vector<4x256xf32>
    %203 = tpu.matmul %202, %200, %cst_96 {dimension_numbers = #tpu.dot_dimension_numbers<[1], [0], [0], [1], [0, 0, 1, 1], [], []>} : vector<4x12xf32>, vector<12x256xf32>, vector<4x256xf32> -> vector<4x256xf32>
    %204 = arith.addf %197, %203 : vector<4x256xf32>
    %c0_97 = arith.constant 0 : index
    %c112_98 = arith.constant 112 : index
    %205 = vector.load %arg13[%c0_97, %c112_98] : memref<12x512xf32, #tpu.memory_space<vmem>>, vector<12x256xf32>
    %206 = vector.extract_strided_slice %33 {offsets = [1, 0, 0], sizes = [1, 4, 12], strides = [1, 1, 1]} : vector<9x4x12xf32> to vector<1x4x12xf32>
    %207 = vector.shape_cast %206 : vector<1x4x12xf32> to vector<4x12xf32>
    %cst_99 = arith.constant dense<0.000000e+00> : vector<4x256xf32>
    %208 = tpu.matmul %207, %205, %cst_99 {dimension_numbers = #tpu.dot_dimension_numbers<[1], [0], [0], [1], [0, 0, 1, 1], [], []>} : vector<4x12xf32>, vector<12x256xf32>, vector<4x256xf32> -> vector<4x256xf32>
    %209 = arith.addf %204, %208 : vector<4x256xf32>
    %c0_100 = arith.constant 0 : index
    %c113_101 = arith.constant 113 : index
    %210 = vector.load %arg13[%c0_100, %c113_101] : memref<12x512xf32, #tpu.memory_space<vmem>>, vector<12x256xf32>
    %211 = vector.broadcast %24 : vector<1x256xf32> to vector<12x256xf32>
    %212 = arith.mulf %210, %211 : vector<12x256xf32>
    %213 = vector.extract_strided_slice %33 {offsets = [2, 0, 0], sizes = [1, 4, 12], strides = [1, 1, 1]} : vector<9x4x12xf32> to vector<1x4x12xf32>
    %214 = vector.shape_cast %213 : vector<1x4x12xf32> to vector<4x12xf32>
    %cst_102 = arith.constant dense<0.000000e+00> : vector<4x256xf32>
    %215 = tpu.matmul %214, %212, %cst_102 {dimension_numbers = #tpu.dot_dimension_numbers<[1], [0], [0], [1], [0, 0, 1, 1], [], []>} : vector<4x12xf32>, vector<12x256xf32>, vector<4x256xf32> -> vector<4x256xf32>
    %216 = arith.addf %209, %215 : vector<4x256xf32>
    %c0_103 = arith.constant 0 : index
    %c127_104 = arith.constant 127 : index
    %217 = vector.load %arg13[%c0_103, %c127_104] : memref<12x512xf32, #tpu.memory_space<vmem>>, vector<12x256xf32>
    %218 = vector.broadcast %20 : vector<1x256xf32> to vector<12x256xf32>
    %219 = arith.mulf %217, %218 : vector<12x256xf32>
    %220 = vector.extract_strided_slice %33 {offsets = [3, 0, 0], sizes = [1, 4, 12], strides = [1, 1, 1]} : vector<9x4x12xf32> to vector<1x4x12xf32>
    %221 = vector.shape_cast %220 : vector<1x4x12xf32> to vector<4x12xf32>
    %cst_105 = arith.constant dense<0.000000e+00> : vector<4x256xf32>
    %222 = tpu.matmul %221, %219, %cst_105 {dimension_numbers = #tpu.dot_dimension_numbers<[1], [0], [0], [1], [0, 0, 1, 1], [], []>} : vector<4x12xf32>, vector<12x256xf32>, vector<4x256xf32> -> vector<4x256xf32>
    %223 = arith.addf %216, %222 : vector<4x256xf32>
    %c0_106 = arith.constant 0 : index
    %c128_107 = arith.constant 128 : index
    %224 = vector.load %arg13[%c0_106, %c128_107] : memref<12x512xf32, #tpu.memory_space<vmem>>, vector<12x256xf32>
    %225 = vector.extract_strided_slice %33 {offsets = [4, 0, 0], sizes = [1, 4, 12], strides = [1, 1, 1]} : vector<9x4x12xf32> to vector<1x4x12xf32>
    %226 = vector.shape_cast %225 : vector<1x4x12xf32> to vector<4x12xf32>
    %cst_108 = arith.constant dense<0.000000e+00> : vector<4x256xf32>
    %227 = tpu.matmul %226, %224, %cst_108 {dimension_numbers = #tpu.dot_dimension_numbers<[1], [0], [0], [1], [0, 0, 1, 1], [], []>} : vector<4x12xf32>, vector<12x256xf32>, vector<4x256xf32> -> vector<4x256xf32>
    %228 = arith.addf %223, %227 : vector<4x256xf32>
    %c0_109 = arith.constant 0 : index
    %c129_110 = arith.constant 129 : index
    %229 = vector.load %arg13[%c0_109, %c129_110] : memref<12x512xf32, #tpu.memory_space<vmem>>, vector<12x256xf32>
    %230 = vector.broadcast %24 : vector<1x256xf32> to vector<12x256xf32>
    %231 = arith.mulf %229, %230 : vector<12x256xf32>
    %232 = vector.extract_strided_slice %33 {offsets = [5, 0, 0], sizes = [1, 4, 12], strides = [1, 1, 1]} : vector<9x4x12xf32> to vector<1x4x12xf32>
    %233 = vector.shape_cast %232 : vector<1x4x12xf32> to vector<4x12xf32>
    %cst_111 = arith.constant dense<0.000000e+00> : vector<4x256xf32>
    %234 = tpu.matmul %233, %231, %cst_111 {dimension_numbers = #tpu.dot_dimension_numbers<[1], [0], [0], [1], [0, 0, 1, 1], [], []>} : vector<4x12xf32>, vector<12x256xf32>, vector<4x256xf32> -> vector<4x256xf32>
    %235 = arith.addf %228, %234 : vector<4x256xf32>
    %c0_112 = arith.constant 0 : index
    %c143_113 = arith.constant 143 : index
    %236 = vector.load %arg13[%c0_112, %c143_113] : memref<12x512xf32, #tpu.memory_space<vmem>>, vector<12x256xf32>
    %237 = vector.broadcast %20 : vector<1x256xf32> to vector<12x256xf32>
    %238 = arith.mulf %236, %237 : vector<12x256xf32>
    %239 = vector.extract_strided_slice %33 {offsets = [6, 0, 0], sizes = [1, 4, 12], strides = [1, 1, 1]} : vector<9x4x12xf32> to vector<1x4x12xf32>
    %240 = vector.shape_cast %239 : vector<1x4x12xf32> to vector<4x12xf32>
    %cst_114 = arith.constant dense<0.000000e+00> : vector<4x256xf32>
    %241 = tpu.matmul %240, %238, %cst_114 {dimension_numbers = #tpu.dot_dimension_numbers<[1], [0], [0], [1], [0, 0, 1, 1], [], []>} : vector<4x12xf32>, vector<12x256xf32>, vector<4x256xf32> -> vector<4x256xf32>
    %242 = arith.addf %235, %241 : vector<4x256xf32>
    %c0_115 = arith.constant 0 : index
    %c144_116 = arith.constant 144 : index
    %243 = vector.load %arg13[%c0_115, %c144_116] : memref<12x512xf32, #tpu.memory_space<vmem>>, vector<12x256xf32>
    %244 = vector.extract_strided_slice %33 {offsets = [7, 0, 0], sizes = [1, 4, 12], strides = [1, 1, 1]} : vector<9x4x12xf32> to vector<1x4x12xf32>
    %245 = vector.shape_cast %244 : vector<1x4x12xf32> to vector<4x12xf32>
    %cst_117 = arith.constant dense<0.000000e+00> : vector<4x256xf32>
    %246 = tpu.matmul %245, %243, %cst_117 {dimension_numbers = #tpu.dot_dimension_numbers<[1], [0], [0], [1], [0, 0, 1, 1], [], []>} : vector<4x12xf32>, vector<12x256xf32>, vector<4x256xf32> -> vector<4x256xf32>
    %247 = arith.addf %242, %246 : vector<4x256xf32>
    %c0_118 = arith.constant 0 : index
    %c145_119 = arith.constant 145 : index
    %248 = vector.load %arg13[%c0_118, %c145_119] : memref<12x512xf32, #tpu.memory_space<vmem>>, vector<12x256xf32>
    %249 = vector.broadcast %24 : vector<1x256xf32> to vector<12x256xf32>
    %250 = arith.mulf %248, %249 : vector<12x256xf32>
    %251 = vector.extract_strided_slice %33 {offsets = [8, 0, 0], sizes = [1, 4, 12], strides = [1, 1, 1]} : vector<9x4x12xf32> to vector<1x4x12xf32>
    %252 = vector.shape_cast %251 : vector<1x4x12xf32> to vector<4x12xf32>
    %cst_120 = arith.constant dense<0.000000e+00> : vector<4x256xf32>
    %253 = tpu.matmul %252, %250, %cst_120 {dimension_numbers = #tpu.dot_dimension_numbers<[1], [0], [0], [1], [0, 0, 1, 1], [], []>} : vector<4x12xf32>, vector<12x256xf32>, vector<4x256xf32> -> vector<4x256xf32>
    %254 = arith.addf %247, %253 : vector<4x256xf32>
    %255 = vector.broadcast %34 : vector<4x1xf32> to vector<4x256xf32>
    %256 = arith.addf %254, %255 : vector<4x256xf32>
    %cst_121 = arith.constant 0.000000e+00 : f32
    %257 = vector.broadcast %cst_121 : f32 to vector<4x256xf32>
    %258 = arith.maximumf %256, %257 : vector<4x256xf32>
    %c0_122 = arith.constant 0 : index
    %c0_123 = arith.constant 0 : index
    %c0_124 = arith.constant 0 : index
    %259 = vector.load %arg1[%c0_122, %c0_123, %c0_124] : memref<1x4x256xf32, #tpu.memory_space<vmem>>, vector<1x4x256xf32>
    %260 = vector.shape_cast %259 : vector<1x4x256xf32> to vector<4x256xf32>
    %c0_125 = arith.constant 0 : index
    %c128_126 = arith.constant 128 : index
    %261 = vector.load %arg13[%c0_125, %c128_126] : memref<12x512xf32, #tpu.memory_space<vmem>>, vector<4x256xf32>
    tpu.vector_store %arg13[%c0_125, %c128_126], %260 {strides = array<i32>} : memref<12x512xf32, #tpu.memory_space<vmem>>, vector<4x256xf32>,
    %c4_127 = arith.constant 4 : index
    %c128_128 = arith.constant 128 : index
    %262 = vector.load %arg13[%c4_127, %c128_128] : memref<12x512xf32, #tpu.memory_space<vmem>>, vector<4x256xf32>
    tpu.vector_store %arg13[%c4_127, %c128_128], %258 {strides = array<i32>} : memref<12x512xf32, #tpu.memory_space<vmem>>, vector<4x256xf32>,
    %cst_129 = arith.constant 0.000000e+00 : f32
    %263 = vector.broadcast %cst_129 : f32 to vector<4x256xf32>
    %c0_130 = arith.constant 0 : index
    %c111_131 = arith.constant 111 : index
    %264 = vector.load %arg13[%c0_130, %c111_131] : memref<12x512xf32, #tpu.memory_space<vmem>>, vector<8x256xf32>
    %265 = vector.broadcast %20 : vector<1x256xf32> to vector<8x256xf32>
    %266 = arith.mulf %264, %265 : vector<8x256xf32>
    %267 = vector.extract_strided_slice %35 {offsets = [0, 0, 0], sizes = [1, 4, 8], strides = [1, 1, 1]} : vector<9x4x8xf32> to vector<1x4x8xf32>
    %268 = vector.shape_cast %267 : vector<1x4x8xf32> to vector<4x8xf32>
    %cst_132 = arith.constant dense<0.000000e+00> : vector<4x256xf32>
    %269 = tpu.matmul %268, %266, %cst_132 {dimension_numbers = #tpu.dot_dimension_numbers<[1], [0], [0], [1], [0, 0, 1, 1], [], []>} : vector<4x8xf32>, vector<8x256xf32>, vector<4x256xf32> -> vector<4x256xf32>
    %270 = arith.addf %263, %269 : vector<4x256xf32>
    %c0_133 = arith.constant 0 : index
    %c112_134 = arith.constant 112 : index
    %271 = vector.load %arg13[%c0_133, %c112_134] : memref<12x512xf32, #tpu.memory_space<vmem>>, vector<8x256xf32>
    %272 = vector.extract_strided_slice %35 {offsets = [1, 0, 0], sizes = [1, 4, 8], strides = [1, 1, 1]} : vector<9x4x8xf32> to vector<1x4x8xf32>
    %273 = vector.shape_cast %272 : vector<1x4x8xf32> to vector<4x8xf32>
    %cst_135 = arith.constant dense<0.000000e+00> : vector<4x256xf32>
    %274 = tpu.matmul %273, %271, %cst_135 {dimension_numbers = #tpu.dot_dimension_numbers<[1], [0], [0], [1], [0, 0, 1, 1], [], []>} : vector<4x8xf32>, vector<8x256xf32>, vector<4x256xf32> -> vector<4x256xf32>
    %275 = arith.addf %270, %274 : vector<4x256xf32>
    %c0_136 = arith.constant 0 : index
    %c113_137 = arith.constant 113 : index
    %276 = vector.load %arg13[%c0_136, %c113_137] : memref<12x512xf32, #tpu.memory_space<vmem>>, vector<8x256xf32>
    %277 = vector.broadcast %24 : vector<1x256xf32> to vector<8x256xf32>
    %278 = arith.mulf %276, %277 : vector<8x256xf32>
    %279 = vector.extract_strided_slice %35 {offsets = [2, 0, 0], sizes = [1, 4, 8], strides = [1, 1, 1]} : vector<9x4x8xf32> to vector<1x4x8xf32>
    %280 = vector.shape_cast %279 : vector<1x4x8xf32> to vector<4x8xf32>
    %cst_138 = arith.constant dense<0.000000e+00> : vector<4x256xf32>
    %281 = tpu.matmul %280, %278, %cst_138 {dimension_numbers = #tpu.dot_dimension_numbers<[1], [0], [0], [1], [0, 0, 1, 1], [], []>} : vector<4x8xf32>, vector<8x256xf32>, vector<4x256xf32> -> vector<4x256xf32>
    %282 = arith.addf %275, %281 : vector<4x256xf32>
    %c0_139 = arith.constant 0 : index
    %c127_140 = arith.constant 127 : index
    %283 = vector.load %arg13[%c0_139, %c127_140] : memref<12x512xf32, #tpu.memory_space<vmem>>, vector<8x256xf32>
    %284 = vector.broadcast %20 : vector<1x256xf32> to vector<8x256xf32>
    %285 = arith.mulf %283, %284 : vector<8x256xf32>
    %286 = vector.extract_strided_slice %35 {offsets = [3, 0, 0], sizes = [1, 4, 8], strides = [1, 1, 1]} : vector<9x4x8xf32> to vector<1x4x8xf32>
    %287 = vector.shape_cast %286 : vector<1x4x8xf32> to vector<4x8xf32>
    %cst_141 = arith.constant dense<0.000000e+00> : vector<4x256xf32>
    %288 = tpu.matmul %287, %285, %cst_141 {dimension_numbers = #tpu.dot_dimension_numbers<[1], [0], [0], [1], [0, 0, 1, 1], [], []>} : vector<4x8xf32>, vector<8x256xf32>, vector<4x256xf32> -> vector<4x256xf32>
    %289 = arith.addf %282, %288 : vector<4x256xf32>
    %c0_142 = arith.constant 0 : index
    %c128_143 = arith.constant 128 : index
    %290 = vector.load %arg13[%c0_142, %c128_143] : memref<12x512xf32, #tpu.memory_space<vmem>>, vector<8x256xf32>
    %291 = vector.extract_strided_slice %35 {offsets = [4, 0, 0], sizes = [1, 4, 8], strides = [1, 1, 1]} : vector<9x4x8xf32> to vector<1x4x8xf32>
    %292 = vector.shape_cast %291 : vector<1x4x8xf32> to vector<4x8xf32>
    %cst_144 = arith.constant dense<0.000000e+00> : vector<4x256xf32>
    %293 = tpu.matmul %292, %290, %cst_144 {dimension_numbers = #tpu.dot_dimension_numbers<[1], [0], [0], [1], [0, 0, 1, 1], [], []>} : vector<4x8xf32>, vector<8x256xf32>, vector<4x256xf32> -> vector<4x256xf32>
    %294 = arith.addf %289, %293 : vector<4x256xf32>
    %c0_145 = arith.constant 0 : index
    %c129_146 = arith.constant 129 : index
    %295 = vector.load %arg13[%c0_145, %c129_146] : memref<12x512xf32, #tpu.memory_space<vmem>>, vector<8x256xf32>
    %296 = vector.broadcast %24 : vector<1x256xf32> to vector<8x256xf32>
    %297 = arith.mulf %295, %296 : vector<8x256xf32>
    %298 = vector.extract_strided_slice %35 {offsets = [5, 0, 0], sizes = [1, 4, 8], strides = [1, 1, 1]} : vector<9x4x8xf32> to vector<1x4x8xf32>
    %299 = vector.shape_cast %298 : vector<1x4x8xf32> to vector<4x8xf32>
    %cst_147 = arith.constant dense<0.000000e+00> : vector<4x256xf32>
    %300 = tpu.matmul %299, %297, %cst_147 {dimension_numbers = #tpu.dot_dimension_numbers<[1], [0], [0], [1], [0, 0, 1, 1], [], []>} : vector<4x8xf32>, vector<8x256xf32>, vector<4x256xf32> -> vector<4x256xf32>
    %301 = arith.addf %294, %300 : vector<4x256xf32>
    %c0_148 = arith.constant 0 : index
    %c143_149 = arith.constant 143 : index
    %302 = vector.load %arg13[%c0_148, %c143_149] : memref<12x512xf32, #tpu.memory_space<vmem>>, vector<8x256xf32>
    %303 = vector.broadcast %20 : vector<1x256xf32> to vector<8x256xf32>
    %304 = arith.mulf %302, %303 : vector<8x256xf32>
    %305 = vector.extract_strided_slice %35 {offsets = [6, 0, 0], sizes = [1, 4, 8], strides = [1, 1, 1]} : vector<9x4x8xf32> to vector<1x4x8xf32>
    %306 = vector.shape_cast %305 : vector<1x4x8xf32> to vector<4x8xf32>
    %cst_150 = arith.constant dense<0.000000e+00> : vector<4x256xf32>
    %307 = tpu.matmul %306, %304, %cst_150 {dimension_numbers = #tpu.dot_dimension_numbers<[1], [0], [0], [1], [0, 0, 1, 1], [], []>} : vector<4x8xf32>, vector<8x256xf32>, vector<4x256xf32> -> vector<4x256xf32>
    %308 = arith.addf %301, %307 : vector<4x256xf32>
    %c0_151 = arith.constant 0 : index
    %c144_152 = arith.constant 144 : index
    %309 = vector.load %arg13[%c0_151, %c144_152] : memref<12x512xf32, #tpu.memory_space<vmem>>, vector<8x256xf32>
    %310 = vector.extract_strided_slice %35 {offsets = [7, 0, 0], sizes = [1, 4, 8], strides = [1, 1, 1]} : vector<9x4x8xf32> to vector<1x4x8xf32>
    %311 = vector.shape_cast %310 : vector<1x4x8xf32> to vector<4x8xf32>
    %cst_153 = arith.constant dense<0.000000e+00> : vector<4x256xf32>
    %312 = tpu.matmul %311, %309, %cst_153 {dimension_numbers = #tpu.dot_dimension_numbers<[1], [0], [0], [1], [0, 0, 1, 1], [], []>} : vector<4x8xf32>, vector<8x256xf32>, vector<4x256xf32> -> vector<4x256xf32>
    %313 = arith.addf %308, %312 : vector<4x256xf32>
    %c0_154 = arith.constant 0 : index
    %c145_155 = arith.constant 145 : index
    %314 = vector.load %arg13[%c0_154, %c145_155] : memref<12x512xf32, #tpu.memory_space<vmem>>, vector<8x256xf32>
    %315 = vector.broadcast %24 : vector<1x256xf32> to vector<8x256xf32>
    %316 = arith.mulf %314, %315 : vector<8x256xf32>
    %317 = vector.extract_strided_slice %35 {offsets = [8, 0, 0], sizes = [1, 4, 8], strides = [1, 1, 1]} : vector<9x4x8xf32> to vector<1x4x8xf32>
    %318 = vector.shape_cast %317 : vector<1x4x8xf32> to vector<4x8xf32>
    %cst_156 = arith.constant dense<0.000000e+00> : vector<4x256xf32>
    %319 = tpu.matmul %318, %316, %cst_156 {dimension_numbers = #tpu.dot_dimension_numbers<[1], [0], [0], [1], [0, 0, 1, 1], [], []>} : vector<4x8xf32>, vector<8x256xf32>, vector<4x256xf32> -> vector<4x256xf32>
    %320 = arith.addf %313, %319 : vector<4x256xf32>
    %321 = vector.broadcast %36 : vector<4x1xf32> to vector<4x256xf32>
    %322 = arith.addf %320, %321 : vector<4x256xf32>
    %cst_157 = arith.constant 0.000000e+00 : f32
    %323 = vector.broadcast %cst_157 : f32 to vector<4x256xf32>
    %324 = arith.maximumf %322, %323 : vector<4x256xf32>
    %c0_158 = arith.constant 0 : index
    %c0_159 = arith.constant 0 : index
    %c0_160 = arith.constant 0 : index
    %325 = vector.load %arg12[%c0_158, %c0_159, %c0_160] : memref<1x4x256xf32, #tpu.memory_space<vmem>>, vector<1x4x256xf32>
    %326 = vector.shape_cast %325 : vector<1x4x256xf32> to vector<4x256xf32>
    %327 = vector.shape_cast %324 : vector<4x256xf32> to vector<1x4x256xf32>
    tpu.vector_store %arg12[%c0_158, %c0_159, %c0_160], %327 {strides = array<i32>} : memref<1x4x256xf32, #tpu.memory_space<vmem>>, vector<1x4x256xf32>,
    return
  }
  func.func @transform_0(%arg0: i32) -> (i32, i32, i32) {
    %c0_i32 = arith.constant 0 : i32
    %c0_i32_0 = arith.constant 0 : i32
    %c0_i32_1 = arith.constant 0 : i32
    return %arg0, %c0_i32, %c0_i32_0 : i32, i32, i32
  }
  func.func @transform_1(%arg0: i32) -> (i32, i32, i32) {
    %c0_i32 = arith.constant 0 : i32
    %c0_i32_0 = arith.constant 0 : i32
    %c0_i32_1 = arith.constant 0 : i32
    return %arg0, %c0_i32, %c0_i32_0 : i32, i32, i32
  }
  func.func @transform_2(%arg0: i32) -> (i32, i32, i32) {
    %c0_i32 = arith.constant 0 : i32
    %c0_i32_0 = arith.constant 0 : i32
    %c0_i32_1 = arith.constant 0 : i32
    return %arg0, %c0_i32, %c0_i32_0 : i32, i32, i32
  }
  func.func @transform_3(%arg0: i32) -> (i32, i32, i32) {
    %c0_i32 = arith.constant 0 : i32
    %c0_i32_0 = arith.constant 0 : i32
    %c0_i32_1 = arith.constant 0 : i32
    %c0_i32_2 = arith.constant 0 : i32
    return %c0_i32, %c0_i32_0, %c0_i32_1 : i32, i32, i32
  }
  func.func @transform_4(%arg0: i32) -> (i32, i32) {
    %c0_i32 = arith.constant 0 : i32
    %c0_i32_0 = arith.constant 0 : i32
    %c0_i32_1 = arith.constant 0 : i32
    return %c0_i32, %c0_i32_0 : i32, i32
  }
  func.func @transform_5(%arg0: i32) -> (i32, i32, i32) {
    %c0_i32 = arith.constant 0 : i32
    %c0_i32_0 = arith.constant 0 : i32
    %c0_i32_1 = arith.constant 0 : i32
    %c0_i32_2 = arith.constant 0 : i32
    return %c0_i32, %c0_i32_0, %c0_i32_1 : i32, i32, i32
  }
  func.func @transform_6(%arg0: i32) -> (i32, i32) {
    %c0_i32 = arith.constant 0 : i32
    %c0_i32_0 = arith.constant 0 : i32
    %c0_i32_1 = arith.constant 0 : i32
    return %c0_i32, %c0_i32_0 : i32, i32
  }
  func.func @transform_7(%arg0: i32) -> (i32, i32, i32) {
    %c0_i32 = arith.constant 0 : i32
    %c0_i32_0 = arith.constant 0 : i32
    %c0_i32_1 = arith.constant 0 : i32
    %c0_i32_2 = arith.constant 0 : i32
    return %c0_i32, %c0_i32_0, %c0_i32_1 : i32, i32, i32
  }
  func.func @transform_8(%arg0: i32) -> (i32, i32) {
    %c0_i32 = arith.constant 0 : i32
    %c0_i32_0 = arith.constant 0 : i32
    %c0_i32_1 = arith.constant 0 : i32
    return %c0_i32, %c0_i32_0 : i32, i32
  }
  func.func @transform_9(%arg0: i32) -> (i32, i32, i32) {
    %c0_i32 = arith.constant 0 : i32
    %c0_i32_0 = arith.constant 0 : i32
    %c0_i32_1 = arith.constant 0 : i32
    %c0_i32_2 = arith.constant 0 : i32
    return %c0_i32, %c0_i32_0, %c0_i32_1 : i32, i32, i32
  }
  func.func @transform_10(%arg0: i32) -> (i32, i32) {
    %c0_i32 = arith.constant 0 : i32
    %c0_i32_0 = arith.constant 0 : i32
    %c0_i32_1 = arith.constant 0 : i32
    return %c0_i32, %c0_i32_0 : i32, i32
  }
  func.func @transform_11(%arg0: i32) -> (i32, i32, i32) {
    %c0_i32 = arith.constant 0 : i32
    %c0_i32_0 = arith.constant 0 : i32
    %c0_i32_1 = arith.constant 0 : i32
    return %arg0, %c0_i32, %c0_i32_0 : i32, i32, i32
  }
}

</mosaic_0001>

<bundles_post_ra>
// kernel: tpu_custom_call.1
= control target key start
LH: loop header
LB: loop body
LE: loop exit
PB: predicated region body
PF: predicated region fallthrough
CT: control target
= control target key end

     0   :  { %s5797_s0 = inlined_call_operand.vmem [shape: f32[2,4,256], index: 0, kind: input, shape index: {}]   ;;  %s5798_s1 = inlined_call_operand.vmem [shape: f32[2,4,256], index: 1, kind: input, shape index: {}]   ;;  %s5799_s2 = inlined_call_operand.vmem [shape: f32[2,4,256], index: 2, kind: input, shape index: {}]   ;;  %s5800_s3 = inlined_call_operand.vmem [shape: f32[9,4,8], index: 3, kind: input, shape index: {}]   ;;  %s5801_s4 = inlined_call_operand.vmem [shape: f32[4,1], index: 4, kind: input, shape index: {}]   ;;  %s5802_s5 = inlined_call_operand.vmem [shape: f32[9,4,4], index: 5, kind: input, shape index: {}]   ;;  %s5803_s6 = inlined_call_operand.vmem [shape: f32[4,1], index: 6, kind: input, shape index: {}]   ;;  %s5804_s7 = inlined_call_operand.vmem [shape: f32[9,4,12], index: 7, kind: input, shape index: {}]   ;;  %s5805_s8 = inlined_call_operand.vmem [shape: f32[4,1], index: 8, kind: input, shape index: {}]   ;;  %s5806_s9 = inlined_call_operand.vmem [shape: f32[9,4,8], index: 9, kind: input, shape index: {}]   ;;  %s5807_s10 = inlined_call_operand.vmem [shape: f32[4,1], index: 10, kind: input, shape index: {}]   ;;  %s5808_s11 = inlined_call_operand.hbm [shape: f32[2,4,256], index: 11, kind: output, shape index: {}]  }
   0x1   :  { %5825 = sst [smem:[#allocation6_spill]] %s5797_s0 }
   0x2   :  { %16 = vsyncpa [#allocation4], 0 }
   0x3   :  { %18 = vsyncpa [#allocation4 + $0x1], 0  ;;  %s4885_s17 = smov 0   ;;  %s4887_s18 = smov 0  }
   0x4   :  { %s4889_s19 = smov 0   ;;  %s4891_s20 = smov 0  }
   0x5 LB: > { %s4906_s21 = sadd.s32 4294967295, %s4811_s20   ;;  %s4313_s22 = sadd.s32 4294967294, %s4811_s20   ;;  %s4811_s20 = sphi %s4891_s20, %s5842_s20   ;;  %s4807_s19 = sphi %s4889_s19, %s5841_s19   ;;  %s4803_s18 = sphi %s4887_s18, %s5840_s18   ;;  %s4799_s17 = sphi %s4885_s17, %s5839_s17  }
   0x6   : > { %s4910_s23 = sadd.s32 1, %s4811_s20   ;;  %s277_s24 = sadd.s32 1, %s4807_s19 }
   0x7   : > { %s274_s25 = ssub.s32 %s4811_s20, %s4910_s23  ;;  %p287_p0 = scmp.ne.s32.totalorder %s4807_s19, %s4803_s18 }
   0x8   : > { %p275_p1 = scmp.eq.s32.totalorder %s274_s25, 0  ;;  %p288_p2 = scmp.eq.s32.totalorder %s4906_s21, 1 }
   0x9   : > { %p293_p3 = scmp.ne.s32.totalorder %s4803_s18, %s4799_s17  ;;  %p294_p4 = scmp.eq.s32.totalorder %s4313_s22, 1 }
   0xa   : > { %s4921_s26 = scalar_select %p275_p1, %s4807_s19, %s277_s24  }
   0xb   : > { %p4923_p5 = por %p288_p2, %p287_p0  ;;  %p4927_p6 = por %p294_p4, %p293_p3 }
   0xc   : > { %p4316_p7 = scmp.ge.s32.totalorder %s4811_s20, 1  ;;  %p360_p8 = scmp.lt.s32.totalorder %s4811_s20, 3 }
   0xe   : > { %p361_p9 = pnand %p4316_p7, %p360_p8 }
   0xf   : > { %p410_p10 = scmp.lt.s32.totalorder (!%p361_p9), %s4906_s21, 1  ;;  %v425_v0 = vlaneseq (!%p361_p9)  ;;  %v4813_v1 = vmov (!%p361_p9), 0.0   ;;  %vm513_vm0 = vcmask (!%p361_p9), 1043456   ;;  %s5817_s24 = smov (!%p361_p9), 111   ;;  %vm567_vm5 = vcmask (!%p361_p9), 908288  }
  0x10   : > { %364 = sbr.rel (%p361_p9) target bundleno = 1918 (0x77e), region = 64  ;;  %464 = vst [vmem:[#allocation2] sm:$0xff] (!%p361_p9), %v4813_v1  ;;  %465 = vst [vmem:[#allocation2 + $0x20] sm:$0xf] (!%p361_p9), %v4813_v1  ;;  %672 = vmatprep.mubr.f32.mxu0 (!%p361_p9), %v4813_v1  ;;  %1662 = vmatprep.mubr.f32.mxu1 (!%p361_p9), %v4813_v1  ;;  %s5809_s25 = smov (!%p361_p9), 113   ;;  %vm902_vm6 = vcmask (!%p361_p9), 1039360  }
  0x11   : > { %466 = vst [vmem:[#allocation2 + $0x18] sm:$0xff] (!%p361_p9), %v4813_v1  ;;  %467 = vst [vmem:[#allocation2 + $0x38] sm:$0xf] (!%p361_p9), %v4813_v1  ;;  %v426_v2 = vand.u32 (!%p361_p9), 127, %v425_v0  ;;  %s5821_s12 = smov (!%p361_p9), 15   ;;  %s5819_s13 = smov (!%p361_p9), 17  }
  0x12   : > { %s5823_s15 = smov (!%p361_p9), 16   ;;  %vm785_vm7 = vcmask (!%p361_p9), 924672   ;;  %vm817_vm8 = vcmask (!%p361_p9), 121856   ;;  %vm934_vm9 = vcmask (!%p361_p9), 7168   ;;  %vm700_vm10 = vcmask (!%p361_p9), 138240   ;;  %s5811_s16 = smov (!%p361_p9), 112  }
  0x13   : > { %v427_v3 = vadd.s32 (!%p361_p9), 128, %v426_v2  ;;  %v432_v4 = vand.u32 (!%p361_p9), 15, %v426_v2  ;;  %vm599_vm11 = vcmask (!%p361_p9), 130048   ;;  %vm604_vm12 = vcmask (!%p361_p9), 64512   ;;  %s5831_s0 = sld [smem:[#allocation6_spill]] (!%p361_p9) }
  0x14   : > { %vm1350_vm13 = vcmask (!%p361_p9), 916480   ;;  %vm1590_vm14 = vcmask (!%p361_p9), 31744   ;;  %vm4823_vm15 = vmmov (!%p361_p9), 1  }
  0x15   : > { %v439_v6 = vand.u32 (!%p361_p9), 15, %v427_v3  ;;  %vm452_vm1 = vcmp.ne.s32.totalorder (!%p361_p9), %v432_v4, 0  ;;  %vm458_vm2 = vcmp.ne.s32.totalorder (!%p361_p9), %v432_v4, 15 }
  0x16   : > { %v4324_v10 = vsel (!%p361_p9), %vm452_vm1, 1.0, %v4813_v1  ;;  %v4326_v15 = vsel (!%p361_p9), %vm458_vm2, 1.0, %v4813_v1  ;;  %vm5505_vm1 = vmpackc.low (!%p361_p9), %vm513_vm0, %vm4823_vm15 }
  0x17   : > { %s411_s29 = scalar_select %p410_p10, %s4906_s21, 1  ;;  %vm453_vm3 = vcmp.ne.s32.totalorder %v439_v6, 0  ;;  %vm459_vm4 = vcmp.ne.s32.totalorder %v439_v6, 15  ;;  %v555_v48 = vld [vmem:[#allocation2] sm:$0xf0] }
  0x18   : > { %v4325_v14 = vsel %vm453_vm3, 1.0, %v4813_v1  ;;  %v4327_v16 = vsel %vm459_vm4, 1.0, %v4813_v1  ;;  %v558_v49 = vld [vmem:[#allocation2 + $0x20] sm:$0xf] }
  0x19   : > { %s4941_s30 = sshll.u32 %s411_s29, 3  ;;  %v4579_v19 = vpack.i.bf16 %v4325_v14, %v4324_v10  ;;  %v4584_v21 = vpack.i.bf16 %v4327_v16, %v4326_v15  ;;  %s5815_s29 = smov 1  }
  0x1a   : > { %s419_s14 = scalar_lea.vmem %s5798_s1, %s4941_s30  ;;  %s424_s22 = scalar_lea.vmem %s5799_s2, %s4941_s30 }
  0x1b   : > { %v508_v5 = vld [vmem:[%s419_s14] sm:$0xff]  ;;  %4580 = vrot.lane.b32.xlu1 %v4579_v19, %s5817_s24  ;;  %s5813_s14 = smov 127  }
  0x1c   : > { %v511_v7 = vcombine.high %v508_v5, %v508_v5  ;;  %v514_v8 = vsel %vm513_vm0, %v508_v5, 0.0  ;;  %v509_v9 = vld [vmem:[%s424_s22] sm:$0xff]  ;;  %s5835_s22 = smov 111  }
  0x1d   : > { %v522_v11 = vcombine.high %v509_v9, %v509_v9  ;;  %v524_v12 = vsel %vm513_vm0, %v509_v9, 0.0 }
  0x1e   : > { %v515_v13 = vsel %vm513_vm0, %v511_v7, 0.0 }
  0x1f   : > { %v516_v17 = vadd.f32 %v515_v13, %v514_v8  ;;  %v525_v18 = vsel %vm513_vm0, %v522_v11, 0.0  ;;  %4585 = vrot.lane.b32.xlu1 %v4584_v21, %s5809_s25 }
  0x20   : > { %v526_v20 = vadd.f32 %v525_v18, %v524_v12  ;;  %v585_v12 = vrot.slane %v558_v49, 4 }
  0x21   : > { %517 = vadd.xlane.f32.xlu0 %v516_v17 }
  0x23   : > { %4595 = vrot.lane.b32.xlu1 %v4584_v21, %s5815_s29 }
  0x25   : > { %527 = vadd.xlane.f32.xlu0 %v526_v20 }
  0x27   : > { %4600 = vrot.lane.b32.xlu1 %v4579_v19, %s5821_s12 }
  0x2b   : > { %4605 = vrot.lane.b32.xlu1 %v4584_v21, %s5819_s13 }
  0x3b   : > { %4590 = vrot.lane.b32.xlu0 %v4579_v19, %s5813_s14 }
  0x8d   : > { %v4581_v43 = vpop.permute.xlu1 %4580 }
  0x8e   : > { %v4969_v46 = vunpack.i.h.bf16 %v4581_v43  ;;  %v4971_v47 = vunpack.i.l.bf16 %v4581_v43 }
  0x90   : > { %v4976_v50 = vsel %vm567_vm5, %v4971_v47, %v4969_v46  ;;  %v572_v52 = vmul.f32 %v4971_v47, %v555_v48  ;;  %v575_v53 = vmul.f32 %v4971_v47, %v558_v49 }
  0x91   : > { %v4586_v57 = vpop.permute.xlu1 %4585 }
  0x92   : > { %v4984_v62 = vunpack.i.h.bf16 %v4586_v57  ;;  %v685_v0 = vrot.slane %v572_v52, 4  ;;  %v686_v2 = vrot.slane %v575_v53, 4  ;;  %v5002_v14 = vunpack.i.l.bf16 %v4586_v57 }
  0x94   : > { %v687_v16 = vsel %vm513_vm0, %v685_v0, %v686_v2 }
  0x95   : > { %v4596_v20 = vpop.permute.xlu1 %4595 }
  0x99   : > { %v4601_v52 = vpop.permute.xlu1 %4600 }
  0x9a   : > { %v5053_v57 = vunpack.i.l.bf16 %v4601_v52 }
  0xae   : > { %v518_v22 = vpop.xlane.xlu0 %517 }
  0xaf   : > { %v520_v24 = vmul.f32 0.00390625, %v518_v22 }
  0xb2   : > { %v528_v23 = vpop.xlane.xlu0 %527 }
  0xb3   : > { %v529_v25 = vmul.f32 0.00390625, %v528_v23 }
  0xb5   : > { %v530_v26 = vmax.f32 %v520_v24, %v529_v25 }
  0xb6   : > { %v4591_v58 = vpop.permute.xlu0 %4590 }
  0xb7   : > { %v531_v27 = vsub.f32 %v520_v24, %v530_v26  ;;  %v534_v28 = vsub.f32 %v529_v25, %v530_v26  ;;  %v4994_v8 = vunpack.i.l.bf16 %v4591_v58  ;;  %v5028_v25 = vsel %vm785_vm7, %v5002_v14, %v4984_v62 }
  0xb9   : > { %v532_v29 = vmul.f32 1.442695, %v531_v27  ;;  %v535_v30 = vmul.f32 1.442695, %v534_v28  ;;  %v907_v26 = vmul.f32 %v4994_v8, %v555_v48  ;;  %v910_v27 = vmul.f32 %v4994_v8, %v558_v49 }
  0xbb   : > { %4734 = vpow2.f32 %v532_v29 }
  0xbc   : > { %4736 = vpow2.f32 %v535_v30 }
  0xc5   : > { %v4735_v31 = vpop.eup %4734 }
  0xc6   : > { %v4737_v32 = vpop.eup %4736 }
  0xc7   : > { %v537_v33 = vadd.f32 %v4737_v32, %v4735_v31 }
  0xc9   : > { %4738 = vrcp.f32 %v537_v33  ;;  %v5036_v33 = vld [vmem:[#allocation2 + $0x38] sm:$0xf] }
  0xd3   : > { %v4739_v34 = vpop.eup %4738 }
  0xd4   : > { %v539_v35 = vmul.f32 %v4739_v34, %v4735_v31  ;;  %v542_v36 = vmul.f32 %v4739_v34, %v4737_v32  ;;  %v5034_v32 = vld [vmem:[#allocation2 + $0x18] sm:$0xf0]  ;;  %v5038_v34 = vunpack.i.h.bf16 %v4596_v20 }
  0xd6   : > { %v540_v37 = vmul.f32 %v539_v35, %v508_v5  ;;  %v541_v38 = vmul.f32 %v539_v35, %v511_v7  ;;  %v543_v39 = vmul.f32 %v542_v36, %v509_v9  ;;  %v544_v40 = vmul.f32 %v542_v36, %v522_v11 }
  0xd7   : > { %v4992_v7 = vunpack.i.h.bf16 %v4591_v58  ;;  %v584_v9 = vrot.slane %v555_v48, 4  ;;  %v790_v35 = vmul.f32 %v5002_v14, %v555_v48  ;;  %v793_v36 = vmul.f32 %v5002_v14, %v558_v49 }
  0xd8   : > { %v547_v41 = vrot.slane %v540_v37, 4  ;;  %v548_v42 = vrot.slane %v541_v38, 4  ;;  %553 = vst [vmem:[#allocation2 + $0x28] sm:$0xf] %v543_v39  ;;  %554 = vst [vmem:[#allocation2 + $0x30] sm:$0xf] %v544_v40  ;;  %v4965_v44 = vadd.f32 %v543_v39, %v540_v37  ;;  %v4967_v45 = vadd.f32 %v544_v40, %v541_v38 }
  0xd9   : > { %v5018_v19 = vsel %vm902_vm6, %v4994_v8, %v4992_v7  ;;  %v586_v21 = vsel %vm513_vm0, %v584_v9, %v585_v12  ;;  %v1112_v43 = vmul.f32 %v5038_v34, %v5036_v33 }
  0xda   : > { %551 = vst [vmem:[#allocation2 + $0x8] sm:$0xf0] %v547_v41  ;;  %552 = vst [vmem:[#allocation2 + $0x10] sm:$0xf0] %v548_v42  ;;  %v919_v41 = vrot.slane %v907_v26, 4  ;;  %v1109_v42 = vmul.f32 %v5038_v34, %v5034_v32 }
  0xdb   : > { %v1126_v9 = vrot.slane %v1112_v43, 4 }
  0xdf   : > { %v559_v51 = vld [vmem:[#allocation2 + $0x28] sm:$0xf]  ;;  %v4986_v63 = vld [vmem:[#allocation2 + $0x30] sm:$0xf] }
  0xe0   : > { %v576_v54 = vmul.f32 %v4976_v50, %v559_v51  ;;  %v588_v60 = vrot.slane %v559_v51, 4  ;;  %v591_v11 = vrot.slane %v4986_v63, 4  ;;  %v795_v17 = vmul.f32 %v4984_v62, %v4986_v63 }
  0xe1   : > { %v556_v55 = vld [vmem:[#allocation2 + $0x8] sm:$0xf0]  ;;  %v4981_v56 = vld [vmem:[#allocation2 + $0x10] sm:$0xf0]  ;;  %v577_v23 = vmul.f32 %v4969_v46, %v4986_v63  ;;  %v911_v30 = vmul.f32 %v5018_v19, %v559_v51  ;;  %v794_v40 = vmul.f32 %v5028_v25, %v559_v51 }
  0xe2   : > { %v587_v59 = vrot.slane %v556_v55, 4  ;;  %v573_v61 = vmul.f32 %v4976_v50, %v556_v55  ;;  %v689_v5 = vrot.slane %v576_v54, 4  ;;  %v590_v6 = vrot.slane %v4981_v56, 4  ;;  %v5062_v2 = vld [vmem:[#allocation2 + $0x10] sm:$0xf0] }
  0xe3   : > { %v792_v13 = vmul.f32 %v4984_v62, %v4981_v56  ;;  %v574_v18 = vmul.f32 %v4969_v46, %v4981_v56  ;;  %v908_v24 = vmul.f32 %v5018_v19, %v556_v55  ;;  %v809_v28 = vrot.slane %v795_v17, 4 }
  0xe4   : > { %v4989_v3 = vsel %vm513_vm0, %v587_v59, %v588_v60  ;;  %v688_v4 = vrot.slane %v573_v61, 4  ;;  %v5006_v15 = vsel %vm513_vm0, %v590_v6, %v591_v11  ;;  %v791_v31 = vmul.f32 %v5028_v25, %v556_v55  ;;  %v5069_v11 = vld [vmem:[#allocation2 + $0x30] sm:$0xf] }
  0xe5   : > { %595 = vrot.lane.b32.xlu1 %v4989_v3, %s5823_s15  ;;  %v808_v22 = vrot.slane %v792_v13, 4  ;;  %v691_v29 = vrot.slane %v574_v18, 4  ;;  %v692_v38 = vrot.slane %v577_v23, 4  ;;  %v922_v39 = vrot.slane %v908_v24, 4  ;;  %v5093_v23 = vld [vmem:[#allocation2 + $0x28] sm:$0xf]  ;;  %v4606_v24 = vpop.permute.xlu1 %4605 }
  0xe6   : > { %v690_v10 = vsel %vm513_vm0, %v688_v4, %v689_v5  ;;  %v923_v53 = vrot.slane %v911_v30, 4  ;;  %v805_v49 = vrot.slane %v791_v31, 4  ;;  %v920_v54 = vrot.slane %v910_v27, 4 }
  0xe7   : > { %696 = vrot.lane.b32.xlu0 %v690_v10, %s5819_s13  ;;  %v810_v37 = vsel %vm513_vm0, %v808_v22, %v809_v28  ;;  %v693_v48 = vsel %vm513_vm0, %v691_v29, %v692_v38  ;;  %v5051_v55 = vunpack.i.h.bf16 %v4601_v52  ;;  %v806_v58 = vrot.slane %v794_v40, 4 }
  0xe8   : > { %v924_v51 = vsel %vm513_vm0, %v922_v39, %v923_v53  ;;  %v802_v59 = vrot.slane %v790_v35, 4  ;;  %v803_v60 = vrot.slane %v793_v36, 4  ;;  %v5057_v61 = vunpack.i.l.bf16 %v4596_v20 }
  0xe9   : > { %597 = vrot.lane.b32.xlu1 %v5006_v15, %s5823_s15  ;;  %v909_v0 = vmul.f32 %v4992_v7, %v4981_v56  ;;  %v807_v4 = vsel %vm513_vm0, %v805_v49, %v806_v58  ;;  %v921_v5 = vsel %vm513_vm0, %v919_v41, %v920_v54  ;;  %v1125_v6 = vrot.slane %v1109_v42, 4 }
  0xea   : > { %v912_v10 = vmul.f32 %v4992_v7, %v4986_v63  ;;  %v5074_v56 = vsel %vm817_vm8, %v5053_v57, %v5051_v55  ;;  %v804_v12 = vsel %vm513_vm0, %v802_v59, %v803_v60  ;;  %v5083_v17 = vsel %vm934_vm9, %v5057_v61, %v5038_v34  ;;  %v5085_v63 = vld [vmem:[#allocation2 + $0x8] sm:$0xf0] }
  0xeb   : > { %694 = vrot.lane.b32.xlu0 %v687_v16, %s5819_s13  ;;  %v1223_v13 = vmul.f32 %v5074_v56, %v5062_v2  ;;  %v925_v16 = vrot.slane %v909_v0, 4  ;;  %v1127_v18 = vsel %vm513_vm0, %v1125_v6, %v1126_v9  ;;  %v1226_v20 = vmul.f32 %v5074_v56, %v5069_v11 }
  0xec   : > { %v926_v22 = vrot.slane %v912_v10, 4  ;;  %v1111_v27 = vmul.f32 %v5083_v17, %v5069_v11  ;;  %v1222_v28 = vmul.f32 %v5053_v57, %v5085_v63  ;;  %v1225_v35 = vmul.f32 %v5053_v57, %v5093_v23 }
  0xed   : > { %593 = vrot.lane.b32.xlu1 %v586_v21, %s5823_s15  ;;  %v1108_v21 = vmul.f32 %v5083_v17, %v5062_v2  ;;  %v1237_v26 = vrot.slane %v1223_v13, 4  ;;  %v1238_v30 = vrot.slane %v1226_v20, 4  ;;  %v1107_v36 = vmul.f32 %v5057_v61, %v5085_v63 }
  0xee   : > { %v927_v29 = vsel %vm513_vm0, %v925_v16, %v926_v22  ;;  %v5107_v38 = vunpack.i.l.bf16 %v4606_v24  ;;  %v1224_v39 = vmul.f32 %v5051_v55, %v5034_v32  ;;  %v1227_v40 = vmul.f32 %v5051_v55, %v5036_v33 }
  0xef   : > { %815 = vrot.lane.b32.xlu0 %v810_v37, %s5821_s12  ;;  %v1122_v31 = vrot.slane %v1108_v21, 4  ;;  %v5105_v37 = vunpack.i.h.bf16 %v4606_v24  ;;  %v1239_v41 = vsel %vm513_vm0, %v1237_v26, %v1238_v30  ;;  %v1123_v42 = vrot.slane %v1111_v27, 4 }
  0xf0   : > { %v1234_v43 = vrot.slane %v1222_v28, 4  ;;  %v1110_v52 = vmul.f32 %v5057_v61, %v5093_v23  ;;  %v1235_v49 = vrot.slane %v1225_v35, 4  ;;  %v1119_v54 = vrot.slane %v1107_v36, 4 }
  0xf1   : > { %698 = vrot.lane.b32.xlu1 %v693_v48, %s5819_s13  ;;  %v1341_v48 = vrot.slane %v5034_v32, 4  ;;  %v1124_v53 = vsel %vm513_vm0, %v1122_v31, %v1123_v42  ;;  %v1240_v58 = vrot.slane %v1224_v39, 4  ;;  %v5125_v59 = vsel %vm700_vm10, %v5107_v38, %v5105_v37 }
  0xf2   : > { %v1236_v60 = vsel %vm513_vm0, %v1234_v43, %v1235_v49  ;;  %v1120_v0 = vrot.slane %v1110_v52, 4  ;;  %v1443_v10 = vmul.f32 %v5125_v59, %v5069_v11  ;;  %v1439_v16 = vmul.f32 %v5107_v38, %v5085_v63 }
  0xf3   : > { %930 = vrot.lane.b32.xlu0 %v924_v51, %s5815_s29  ;;  %v1342_v51 = vrot.slane %v5036_v33, 4  ;;  %v1338_v20 = vrot.slane %v5062_v2, 4  ;;  %v1442_v21 = vmul.f32 %v5107_v38, %v5093_v23  ;;  %v1441_v22 = vmul.f32 %v5105_v37, %v5034_v32 }
  0xf4   : > { %v1121_v6 = vsel %vm513_vm0, %v1119_v54, %v1120_v0  ;;  %v1339_v26 = vrot.slane %v5069_v11, 4  ;;  %v1451_v27 = vrot.slane %v1439_v16, 4  ;;  %v1444_v28 = vmul.f32 %v5105_v37, %v5036_v33  ;;  %v468_v0 = vld [vmem:[%s5800_s3] sm:$0xf] }
  0xf5   : > { %813 = vrot.lane.b32.xlu1 %v807_v4, %s5821_s12  ;;  %v1241_v4 = vrot.slane %v1227_v40, 4  ;;  %v1343_v9 = vsel %vm513_vm0, %v1341_v48, %v1342_v51  ;;  %v1335_v30 = vrot.slane %v5085_v63, 4  ;;  %v1336_v32 = vrot.slane %v5093_v23, 4  ;;  %v477_v63 = vld [vmem:[%s5801_s4] sm:$0xf] }
  0xf6   : > { %v1457_v35 = vrot.slane %v1441_v22, 4  ;;  %v1458_v36 = vrot.slane %v1444_v28, 4  ;;  %v4822_v39 = vmov 0   ;;  %v469_v48 = vld [vmem:[%s5800_s3 + $0x4] sm:$0xf] }
  0xf7   : > { %928 = vrot.lane.b32.xlu0 %v921_v5, %s5815_s29  ;;  %v1440_v5 = vmul.f32 %v5125_v59, %v5062_v2  ;;  %v1340_v2 = vsel %vm513_vm0, %v1338_v20, %v1339_v26  ;;  %v1337_v11 = vsel %vm513_vm0, %v1335_v30, %v1336_v32  ;;  %4609 = vset.pattern.permute.xlu1 %v4822_v39 }
  0xf8   : > { %v1459_v33 = vsel %vm513_vm0, %v1457_v35, %v1458_v36  ;;  %4610 = vset.pattern.permute.xlu0 %v4822_v39 }
  0xf9   : > { %811 = vrot.lane.b32.xlu1 %v804_v12, %s5821_s12  ;;  %v1242_v12 = vsel %vm513_vm0, %v1240_v58, %v1241_v4  ;;  %v1454_v13 = vrot.slane %v1440_v5, 4 }
  0xfb   : > { %1132 = vrot.lane.b32.xlu0 %v1127_v18, %s5813_s14  ;;  %v1455_v18 = vrot.slane %v1443_v10, 4 }
  0xfd   : > { %932 = vrot.lane.b32.xlu1 %v927_v29, %s5815_s29  ;;  %v1456_v24 = vsel %vm513_vm0, %v1454_v13, %v1455_v18  ;;  %v1452_v29 = vrot.slane %v1442_v21, 4  ;;  %v470_v13 = vld [vmem:[%s5800_s3 + $0x8] sm:$0xf]  ;;  %v471_v21 = vld [vmem:[%s5800_s3 + $0xc] sm:$0xf] }
  0xff   : > { %1245 = vrot.lane.b32.xlu0 %v1239_v41, %s5809_s25  ;;  %v1453_v31 = vsel %vm513_vm0, %v1451_v27, %v1452_v29 }
 0x101   : > { %1130 = vrot.lane.b32.xlu1 %v1124_v53, %s5813_s14 }
 0x103   : > { %1243 = vrot.lane.b32.xlu0 %v1236_v60, %s5809_s25 }
 0x105   : > { %1128 = vrot.lane.b32.xlu1 %v1121_v6, %s5813_s14  ;;  %s5829_s14 = smov 113  }
 0x107   : > { %1348 = vrot.lane.b32.xlu0 %v1343_v9, %s5811_s16 }
 0x109   : > { %1247 = vrot.lane.b32.xlu1 %v1242_v12, %s5809_s25  ;;  %s5828_s25 = smov 127  }
 0x10b   : > { %1462 = vrot.lane.b32.xlu0 %v1456_v24, %s5817_s24 }
 0x10d   : > { %1346 = vrot.lane.b32.xlu1 %v1340_v2, %s5811_s16 }
 0x10f   : > { %1460 = vrot.lane.b32.xlu0 %v1453_v31, %s5817_s24  ;;  %v473_v31 = vld [vmem:[%s5800_s3 + $0x14] sm:$0xf] }
 0x111   : > { %1344 = vrot.lane.b32.xlu1 %v1337_v11, %s5811_s16  ;;  %s5830_s16 = smov 112  }
 0x115   : > { %1464 = vrot.lane.b32.xlu1 %v1459_v33, %s5817_s24  ;;  %v474_v33 = vld [vmem:[%s5800_s3 + $0x18] sm:$0xf] }
 0x119   : > { %1548 = vperm.xlu1 %4609, %v477_v63  }
 0x157   : > { %v596_v23 = vpop.permute.xlu1 %595 }
 0x159   : > { %v697_v40 = vpop.permute.xlu0 %696 }
 0x15b   : > { %v598_v41 = vpop.permute.xlu1 %597 }
 0x15c   : > { %v601_v42 = vsel %vm599_vm11, %v596_v23, %v598_v41 }
 0x15d   : > { %608 = vmatprep.subr.mxu0 %v601_v42  ;;  %v695_v43 = vpop.permute.xlu0 %694  ;;  %v475_v42 = vld [vmem:[%s5800_s3 + $0x1c] sm:$0xf] }
 0x15e   : > { %v701_v58 = vsel %vm700_vm10, %v695_v43, %v697_v40 }
 0x15f   : > { %v594_v52 = vpop.permute.xlu1 %593 }
 0x160   : > { %v600_v53 = vsel %vm599_vm11, %v594_v52, %v596_v23  ;;  %v476_v52 = vld [vmem:[%s5800_s3 + $0x20] sm:$0xf] }
 0x161   : > { %609 = vmatpush1.msra.mxu0 %v600_v53  ;;  %v816_v49 = vpop.permute.xlu0 %815 }
 0x162   : > { %4328 = vmatmul.mubr.msk.f32.vlgmr.msra.gmra.mrb[0].mxu0 %vm604_vm12, %v469_v48 }
 0x163   : > { %v699_v54 = vpop.permute.xlu1 %698  ;;  %772 = vmatprep.mubr.f32.mxu0 %v4813_v1 }
 0x164   : > { %v702_v51 = vsel %vm700_vm10, %v697_v40, %v699_v54 }
 0x165   : > { %708 = vmatprep.subr.mxu0 %v702_v51  ;;  %v931_v5 = vpop.permute.xlu0 %930 }
 0x166   : > { %709 = vmatpush1.msra.mxu0 %v701_v58 }
 0x167   : > { %v814_v60 = vpop.permute.xlu1 %813 }
 0x168   : > { %v819_v4 = vsel %vm817_vm8, %v814_v60, %v816_v49 }
 0x169   : > { %825 = vmatprep.subr.mxu0 %v819_v4  ;;  %v929_v10 = vpop.permute.xlu0 %928 }
 0x16a   : > { %4329 = vmatmul.mubr.msk.f32.vlgmr.msra.gmra.mrb[0].mxu0 %vm604_vm12, %v468_v0  ;;  %v935_v18 = vsel %vm934_vm9, %v929_v10, %v931_v5 }
 0x16b   : > { %v812_v6 = vpop.permute.xlu1 %811  ;;  %889 = vmatprep.mubr.f32.mxu0 %v4813_v1 }
 0x16c   : > { %v818_v9 = vsel %vm817_vm8, %v812_v6, %v814_v60 }
 0x16d   : > { %826 = vmatpush1.msra.mxu0 %v818_v9  ;;  %v1133_v22 = vpop.permute.xlu0 %1132 }
 0x16f   : > { %v933_v12 = vpop.permute.xlu1 %932 }
 0x170   : > { %v936_v16 = vsel %vm934_vm9, %v931_v5, %v933_v12 }
 0x171   : > { %942 = vmatprep.subr.mxu0 %v936_v16  ;;  %v1246_v27 = vpop.permute.xlu0 %1245 }
 0x172   : > { %4330 = vmatmul.mubr.msk.f32.vlgmr.msra.gmra.mrb[0].mxu0 %vm604_vm12, %v470_v13 }
 0x173   : > { %943 = vmatpush1.msra.mxu0 %v935_v18  ;;  %v1131_v20 = vpop.permute.xlu1 %1130  ;;  %1006 = vmatprep.mubr.f32.mxu0 %v4813_v1 }
 0x174   : > { %1020 = vmatprep.subr.mxu0 %v5006_v15  ;;  %v1135_v26 = vsel %vm902_vm6, %v1131_v20, %v1133_v22  ;;  %v472_v15 = vld [vmem:[%s5800_s3 + $0x10] sm:$0xf]  ;;  %v1573_v22 = vld [vmem:[#allocation2] sm:$0xf] }
 0x177   : > { %v1129_v24 = vpop.permute.xlu1 %1128 }
 0x178   : > { %v1134_v2 = vsel %vm902_vm6, %v1129_v24, %v1131_v20 }
 0x17a   : > { %4331 = vmatmul.mubr.msk.f32.vlgmr.msra.gmra.mrb[0].mxu0 %vm604_vm12, %v471_v21 }
 0x17b   : > { %1021 = vmatpush1.msra.mxu0 %v4989_v3  ;;  %1084 = vmatprep.mubr.f32.mxu0 %v4813_v1  ;;  %v1248_v28 = vpop.permute.xlu1 %1247  ;;  %v1244_v3 = vpop.permute.xlu0 %1243 }
 0x17c   : > { %1141 = vmatprep.subr.mxu0 %v1135_v26  ;;  %v1250_v29 = vsel %vm785_vm7, %v1246_v27, %v1248_v28  ;;  %v1249_v32 = vsel %vm785_vm7, %v1244_v3, %v1246_v27  ;;  %v1758_v28 = vmul.f32 %v5002_v14, %v1573_v22 }
 0x17f   : > { %v1347_v30 = vpop.permute.xlu1 %1346  ;;  %v1349_v35 = vpop.permute.xlu0 %1348 }
 0x180   : > { %v1352_v11 = vsel %vm1350_vm13, %v1347_v30, %v1349_v35 }
 0x182   : > { %4332 = vmatmul.mubr.msk.f32.vlgmr.msra.gmra.mrb[0].mxu0 %vm604_vm12, %v472_v15 }
 0x183   : > { %1142 = vmatpush1.msra.mxu0 %v1134_v2  ;;  %1205 = vmatprep.mubr.f32.mxu0 %v4813_v1  ;;  %v1345_v36 = vpop.permute.xlu1 %1344  ;;  %v1463_v39 = vpop.permute.xlu0 %1462 }
 0x184   : > { %1256 = vmatprep.subr.mxu0 %v1250_v29  ;;  %v1351_v23 = vsel %vm1350_vm13, %v1345_v36, %v1347_v30  ;;  %v1852_v29 = vmul.f32 %v4994_v8, %v1573_v22  ;;  %v2028_v30 = vld [vmem:[#allocation2 + $0x18] sm:$0xf] }
 0x187   : > { %v1465_v63 = vpop.permute.xlu1 %1464  ;;  %v1461_v41 = vpop.permute.xlu0 %1460 }
 0x188   : > { %v1467_v40 = vsel %vm567_vm5, %v1463_v39, %v1465_v63  ;;  %v1466_v43 = vsel %vm567_vm5, %v1461_v41, %v1463_v39  ;;  %v487_v41 = vld [vmem:[%s5803_s6] sm:$0xf] }
 0x18a   : > { %4333 = vmatmul.mubr.msk.f32.vlgmr.msra.gmra.mrb[0].mxu0 %vm604_vm12, %v473_v31 }
 0x18b   : > { %1257 = vmatpush1.msra.mxu0 %v1249_v32  ;;  %1320 = vmatprep.mubr.f32.mxu0 %v4813_v1  ;;  %v2031_v32 = vmul.f32 %v5038_v34, %v2028_v30 }
 0x18c   : > { %1358 = vmatprep.subr.mxu0 %v1352_v11 }
 0x192   : > { %4334 = vmatmul.mubr.msk.f32.vlgmr.msra.gmra.mrb[0].mxu0 %vm604_vm12, %v474_v33  ;;  %v2125_v33 = vmul.f32 %v5051_v55, %v2028_v30 }
 0x193   : > { %1359 = vmatpush1.msra.mxu0 %v1351_v23  ;;  %1422 = vmatprep.mubr.f32.mxu0 %v4813_v1  ;;  %v2310_v23 = vmul.f32 %v5105_v37, %v2028_v30 }
 0x194   : > { %1473 = vmatprep.subr.mxu0 %v1467_v40 }
 0x198   : > { %v1549_v48 = vpop.permute.xlu1 %1548 }
 0x19a   : > { %4335 = vmatmul.mubr.msk.f32.vlgmr.msra.gmra.mrb[0].mxu0 %vm604_vm12, %v475_v42  ;;  %v5286_v42 = vld [vmem:[#allocation2 + $0x20] sm:$0xf] }
 0x19b   : > { %1474 = vmatpush1.msra.mxu0 %v1466_v43  ;;  %1537 = vmatprep.mubr.f32.mxu0 %v4813_v1  ;;  %v5288_v43 = vld [vmem:[#allocation2 + $0x28] sm:$0xf] }
 0x1a2   : > { %4336 = vmatmul.mubr.msk.f32.vlgmr.msra.gmra.mrb[0].mxu0 %vm604_vm12, %v476_v52  ;;  %v5290_v52 = vld [vmem:[#allocation2 + $0x30] sm:$0xf] }
 0x1a3   : > { %2521 = vmatprep.mubr.f32.mxu0 %v4813_v1 }
 0x275   : > { %v1539_v53 = vpop.f32.mrb[0].mxu0 }
 0x276   : > { %v1551_v49 = vadd.f32 %v1549_v48, %v1539_v53  ;;  %v1541_v54 = vpop.f32.mrb[1].mxu0  ;;  %v2423_v53 = vmul.f32 %v5288_v43, %v4976_v50 }
 0x277   : > { %v1552_v51 = vadd.f32 %v1549_v48, %v1541_v54  ;;  %v4621_v48 = vpack.i.bf16 %v5286_v42, %v4813_v1 }
 0x278   : > { %v1553_v58 = vmax.f32 %v1551_v49, 0.0  ;;  %v2424_v49 = vmul.f32 %v4969_v46, %v5290_v52 }
 0x279   : > { %v1554_v60 = vmax.f32 %v1552_v51, 0.0 }
 0x27a   : > { %v4337_v0 = vmul.f32 -1.442695, %v1553_v58  ;;  %v4626_v54 = vpack.i.bf16 %v2424_v49, %v2423_v53  ;;  %v484_v49 = vld [vmem:[%s5802_s5 + $0x18] sm:$0xf] }
 0x27b   : > { %v4338_v4 = vmul.f32 -1.442695, %v1554_v60 }
 0x27c   : > { %4740 = vpow2.f32 %v4337_v0 }
 0x27d   : > { %4742 = vpow2.f32 %v4338_v4  ;;  %v479_v4 = vld [vmem:[%s5802_s5 + $0x4] sm:$0xf] }
 0x286   : > { %v4741_v5 = vpop.eup %4740 }
 0x287   : > { %v4743_v6 = vpop.eup %4742  ;;  %v1561_v9 = vadd.f32 1.0, %v4741_v5 }
 0x288   : > { %v1562_v10 = vadd.f32 1.0, %v4743_v6 }
 0x289   : > { %4744 = vrcp.f32 %v1561_v9 }
 0x28a   : > { %4746 = vrcp.f32 %v1562_v10 }
 0x293   : > { %v4745_v12 = vpop.eup %4744 }
 0x294   : > { %v4747_v13 = vpop.eup %4746  ;;  %v1569_v16 = vmul.f32 %v4745_v12, %v4965_v44 }
 0x295   : > { %v1570_v18 = vmul.f32 %v4747_v13, %v4967_v45  ;;  %v1576_v45 = vmul.f32 %v4971_v47, %v1573_v22 }
 0x296   : > { %1571 = vst [vmem:[#allocation2 + $0x8] sm:$0xf] %v1569_v16 }
 0x297   : > { %1572 = vst [vmem:[#allocation2 + $0x10] sm:$0xf] %v1570_v18  ;;  %v478_v18 = vld [vmem:[%s5802_s5] sm:$0xf] }
 0x29d   : > { %v5229_v20 = vld [vmem:[#allocation2 + $0x8] sm:$0xf] }
 0x29e   : > { %1584 = vrot.lane.b32.xlu0 %v5229_v20, %s5823_s15  ;;  %v5233_v21 = vld [vmem:[#allocation2 + $0x10] sm:$0xf]  ;;  %v1577_v24 = vmul.f32 %v5229_v20, %v4976_v50  ;;  %v1759_v26 = vmul.f32 %v5229_v20, %v5028_v25  ;;  %v1853_v15 = vmul.f32 %v5229_v20, %v5018_v19  ;;  %v2026_v35 = vld [vmem:[#allocation2 + $0x8] sm:$0xf] }
 0x29f   : > { %1586 = vrot.lane.b32.xlu1 %v5233_v21, %s5823_s15  ;;  %v1578_v44 = vmul.f32 %v4969_v46, %v5233_v21  ;;  %v1760_v27 = vmul.f32 %v4984_v62, %v5233_v21  ;;  %v1854_v2 = vmul.f32 %v4992_v7, %v5233_v21  ;;  %v2027_v3 = vld [vmem:[#allocation2 + $0x10] sm:$0xf]  ;;  %v2029_v36 = vmul.f32 %v5057_v61, %v2026_v35 }
 0x2a0   : > { %v2030_v31 = vmul.f32 %v2027_v3, %v5083_v17  ;;  %v2124_v11 = vmul.f32 %v2027_v3, %v5074_v56  ;;  %v2123_v63 = vmul.f32 %v5053_v57, %v2026_v35  ;;  %v2309_v39 = vmul.f32 %v2027_v3, %v5125_v59 }
 0x2a1   : > { %v2308_v40 = vmul.f32 %v5107_v38, %v2026_v35 }
 0x2a2   : > { %1582 = vrot.lane.b32.xlu0 %v1573_v22, %s5823_s15 }
 0x2a3   : > { %1674 = vrot.lane.b32.xlu1 %v1577_v24, %s5819_s13 }
 0x2a6   : > { %1676 = vrot.lane.b32.xlu0 %v1578_v44, %s5819_s13 }
 0x2a7   : > { %1672 = vrot.lane.b32.xlu1 %v1576_v45, %s5819_s13 }
 0x2aa   : > { %1766 = vrot.lane.b32.xlu0 %v1759_v26, %s5821_s12 }
 0x2ab   : > { %1768 = vrot.lane.b32.xlu1 %v1760_v27, %s5821_s12 }
 0x2ae   : > { %1764 = vrot.lane.b32.xlu0 %v1758_v28, %s5821_s12  ;;  %v480_v28 = vld [vmem:[%s5802_s5 + $0x8] sm:$0xf]  ;;  %s414_s12 = scalar_lea.vmem %s5831_s0, %s4941_s30  ;;  %s5832_s30 = smov 15  }
 0x2af   : > { %1860 = vrot.lane.b32.xlu1 %v1853_v15, %s5815_s29  ;;  %s4410_s0 = sshll.u32 %s4906_s21, 7  ;;  %s4824_s21 = smov [#allocation3]  }
 0x2b2   : > { %1862 = vrot.lane.b32.xlu0 %v1854_v2, %s5815_s29 }
 0x2b3   : > { %1858 = vrot.lane.b32.xlu1 %v1852_v29, %s5815_s29  ;;  %s5834_s29 = smov 1  }
 0x2b6   : > { %2037 = vrot.lane.b32.xlu0 %v2030_v31, %s5828_s25  ;;  %v481_v31 = vld [vmem:[%s5802_s5 + $0xc] sm:$0xf] }
 0x2b7   : > { %2039 = vrot.lane.b32.xlu1 %v2031_v32, %s5828_s25 }
 0x2ba   : > { %2035 = vrot.lane.b32.xlu0 %v2029_v36, %s5828_s25 }
 0x2bb   : > { %2131 = vrot.lane.b32.xlu1 %v2124_v11, %s5829_s14 }
 0x2be   : > { %2133 = vrot.lane.b32.xlu0 %v2125_v33, %s5829_s14 }
 0x2bf   : > { %2129 = vrot.lane.b32.xlu1 %v2123_v63, %s5829_s14 }
 0x2c2   : > { %2222 = vrot.lane.b32.xlu0 %v2027_v3, %s5830_s16 }
 0x2c3   : > { %2224 = vrot.lane.b32.xlu1 %v2028_v30, %s5830_s16 }
 0x2c6   : > { %2220 = vrot.lane.b32.xlu0 %v2026_v35, %s5830_s16 }
 0x2c7   : > { %2316 = vrot.lane.b32.xlu1 %v2309_v39, %s5817_s24 }
 0x2ca   : > { %2318 = vrot.lane.b32.xlu0 %v2310_v23, %s5817_s24  ;;  %v483_v23 = vld [vmem:[%s5802_s5 + $0x14] sm:$0xf] }
 0x2cb   : > { %2314 = vrot.lane.b32.xlu1 %v2308_v40, %s5817_s24  ;;  %s5838_s24 = smov 16  }
 0x2ce   : > { %2404 = vperm.xlu0 %4610, %v487_v41  }
 0x2d2   : > { %4622 = vrot.lane.b32.xlu0 %v4621_v48, %s5823_s15 }
 0x2d6   : > { %4627 = vrot.lane.b32.xlu0 %v4626_v54, %s5819_s13  ;;  %s407_s13 = sand.u32 1, %s4803_s18  }
 0x310   : > { %v1585_v51 = vpop.permute.xlu0 %1584 }
 0x311   : > { %v1587_v58 = vpop.permute.xlu1 %1586 }
 0x312   : > { %v1589_v60 = vsel %vm599_vm11, %v1585_v51, %v1587_v58 }
 0x313   : > { %4339 = vmatprep.subr.msk.mxu1 %vm513_vm0, %v1589_v60 }
 0x314   : > { %v1583_v0 = vpop.permute.xlu0 %1582 }
 0x315   : > { %v1675_v5 = vpop.permute.xlu1 %1674  ;;  %v1588_v6 = vsel %vm599_vm11, %v1583_v0, %v1585_v51 }
 0x316   : > { %4340 = vmatpush1.msk.msra.mxu1 %vm513_vm0, %v1588_v6  ;;  %v5375_v6 = vld [vmem:[#allocation2] sm:$0xff] }
 0x317   : > { %4341 = vmatmul.mubr.msk.f32.vlgmr.msra.gmra.mrb[0].mxu1 %vm1590_vm14, %v479_v4  ;;  %v485_v4 = vld [vmem:[%s5802_s5 + $0x1c] sm:$0xf] }
 0x318   : > { %v1677_v9 = vpop.permute.xlu0 %1676  ;;  %1751 = vmatprep.mubr.f32.mxu1 %v4813_v1 }
 0x319   : > { %v1679_v10 = vsel %vm700_vm10, %v1675_v5, %v1677_v9  ;;  %v1673_v12 = vpop.permute.xlu1 %1672 }
 0x31a   : > { %v1678_v13 = vsel %vm700_vm10, %v1673_v12, %v1675_v5  ;;  %4342 = vmatprep.subr.msk.mxu1 %vm513_vm0, %v1679_v10 }
 0x31b   : > { %4343 = vmatpush1.msk.msra.mxu1 %vm513_vm0, %v1678_v13 }
 0x31c   : > { %v1767_v16 = vpop.permute.xlu0 %1766 }
 0x31d   : > { %v1769_v22 = vpop.permute.xlu1 %1768 }
 0x31e   : > { %v1771_v24 = vsel %vm817_vm8, %v1767_v16, %v1769_v22 }
 0x31f   : > { %4344 = vmatmul.mubr.msk.f32.vlgmr.msra.gmra.mrb[0].mxu1 %vm1590_vm14, %v478_v18  ;;  %4345 = vmatprep.subr.msk.mxu1 %vm513_vm0, %v1771_v24  ;;  %v3379_v24 = vld [vmem:[%s414_s12] sm:$0xff]  ;;  %s5833_s12 = smov 17  }
 0x320   : > { %v1765_v44 = vpop.permute.xlu0 %1764  ;;  %1843 = vmatprep.mubr.f32.mxu1 %v4813_v1 }
 0x321   : > { %v1770_v45 = vsel %vm817_vm8, %v1765_v44, %v1767_v16  ;;  %v1861_v26 = vpop.permute.xlu1 %1860  ;;  %v3381_v44 = vcombine.high %v3379_v24, %v3379_v24 }
 0x322   : > { %4346 = vmatpush1.msk.msra.mxu1 %vm513_vm0, %v1770_v45 }
 0x324   : > { %v1863_v27 = vpop.permute.xlu0 %1862 }
 0x325   : > { %v1865_v15 = vsel %vm934_vm9, %v1861_v26, %v1863_v27  ;;  %v1859_v2 = vpop.permute.xlu1 %1858 }
 0x326   : > { %v1864_v29 = vsel %vm934_vm9, %v1859_v2, %v1861_v26  ;;  %4348 = vmatprep.subr.msk.mxu1 %vm513_vm0, %v1865_v15 }
 0x327   : > { %4347 = vmatmul.mubr.msk.f32.vlgmr.msra.gmra.mrb[0].mxu1 %vm1590_vm14, %v480_v28 }
 0x328   : > { %4349 = vmatpush1.msk.msra.mxu1 %vm513_vm0, %v1864_v29  ;;  %v2038_v3 = vpop.permute.xlu0 %2037  ;;  %1937 = vmatprep.mubr.f32.mxu1 %v4813_v1  ;;  %v5400_v29 = vmul.f32 %v5375_v6, %v5002_v14 }
 0x329   : > { %4351 = vmatprep.subr.msk.mxu1 %vm513_vm0, %v5233_v21  ;;  %v2040_v30 = vpop.permute.xlu1 %2039  ;;  %v482_v21 = vld [vmem:[%s5802_s5 + $0x10] sm:$0xf] }
 0x32a   : > { %v2042_v35 = vsel %vm902_vm6, %v2038_v3, %v2040_v30  ;;  %v4616_v30 = vpack.i.bf16 %v5290_v52, %v5288_v43 }
 0x32c   : > { %v2036_v32 = vpop.permute.xlu0 %2035 }
 0x32d   : > { %v2132_v36 = vpop.permute.xlu1 %2131  ;;  %v2041_v33 = vsel %vm902_vm6, %v2036_v32, %v2038_v3  ;;  %v2633_v3 = vmul.f32 %v5002_v14, %v5286_v42  ;;  %v2745_v14 = vmul.f32 %v4992_v7, %v5290_v52 }
 0x32f   : > { %4350 = vmatmul.mubr.msk.f32.vlgmr.msra.gmra.mrb[0].mxu1 %vm1590_vm14, %v481_v31 }
 0x330   : > { %4352 = vmatpush1.msk.msra.mxu1 %vm513_vm0, %v5229_v20  ;;  %2017 = vmatprep.mubr.f32.mxu1 %v4813_v1  ;;  %v2134_v11 = vpop.permute.xlu0 %2133 }
 0x331   : > { %4354 = vmatprep.subr.msk.mxu1 %vm513_vm0, %v2042_v35  ;;  %v2130_v63 = vpop.permute.xlu1 %2129  ;;  %v2136_v39 = vsel %vm785_vm7, %v2132_v36, %v2134_v11  ;;  %v4651_v35 = vpack.i.bf16 %v2633_v3, %v5400_v29 }
 0x332   : > { %v2135_v41 = vsel %vm785_vm7, %v2130_v63, %v2132_v36  ;;  %v2744_v36 = vmul.f32 %v5288_v43, %v5018_v19 }
 0x334   : > { %v2223_v20 = vpop.permute.xlu0 %2222  ;;  %v4656_v63 = vpack.i.bf16 %v2745_v14, %v2744_v36  ;;  %v5492_v36 = vmul.f32 %v5375_v6, %v5105_v37 }
 0x335   : > { %v2225_v40 = vpop.permute.xlu1 %2224 }
 0x336   : > { %v2227_v53 = vsel %vm1350_vm13, %v2223_v20, %v2225_v40  ;;  %v2634_v40 = vmul.f32 %v5288_v43, %v5028_v25 }
 0x337   : > { %4353 = vmatmul.mubr.msk.f32.vlgmr.msra.gmra.mrb[0].mxu1 %vm1590_vm14, %v482_v21  ;;  %v5420_v21 = vmul.f32 %v5375_v6, %v4971_v47 }
 0x338   : > { %4355 = vmatpush1.msk.msra.mxu1 %vm513_vm0, %v2041_v33  ;;  %2114 = vmatprep.mubr.f32.mxu1 %v4813_v1  ;;  %v2221_v48 = vpop.permute.xlu0 %2220  ;;  %v2422_v33 = vmul.f32 %v4971_v47, %v5286_v42  ;;  %v2635_v47 = vmul.f32 %v4984_v62, %v5290_v52 }
 0x339   : > { %4357 = vmatprep.subr.msk.mxu1 %vm513_vm0, %v2136_v39  ;;  %v2317_v51 = vpop.permute.xlu1 %2316  ;;  %v2226_v58 = vsel %vm1350_vm13, %v2221_v48, %v2223_v20 }
 0x33a   : > { %v4636_v20 = vpack.i.bf16 %v2422_v33, %v5420_v21 }
 0x33c   : > { %v2319_v54 = vpop.permute.xlu0 %2318 }
 0x33d   : > { %v2321_v60 = vsel %vm567_vm5, %v2317_v51, %v2319_v54  ;;  %v2315_v0 = vpop.permute.xlu1 %2314  ;;  %v2935_v54 = vld [vmem:[#allocation2 + $0x38] sm:$0xf] }
 0x33e   : > { %v2320_v5 = vsel %vm567_vm5, %v2315_v0, %v2317_v51  ;;  %v4641_v51 = vpack.i.bf16 %v2635_v47, %v2634_v40 }
 0x33f   : > { %4356 = vmatmul.mubr.msk.f32.vlgmr.msra.gmra.mrb[0].mxu1 %vm1590_vm14, %v483_v23  ;;  %v5431_v23 = vmul.f32 %v5375_v6, %v5038_v34 }
 0x340   : > { %4358 = vmatpush1.msk.msra.mxu1 %vm513_vm0, %v2135_v41  ;;  %2208 = vmatprep.mubr.f32.mxu1 %v4813_v1  ;;  %v2933_v41 = vld [vmem:[#allocation2 + $0x28] sm:$0xf] }
 0x341   : > { %4360 = vmatprep.subr.msk.mxu1 %vm513_vm0, %v2227_v53  ;;  %v3263_v33 = vmul.f32 %v5107_v38, %v2933_v41 }
 0x347   : > { %4359 = vmatmul.mubr.msk.f32.vlgmr.msra.gmra.mrb[0].mxu1 %vm1590_vm14, %v484_v49  ;;  %v2934_v49 = vld [vmem:[#allocation2 + $0x30] sm:$0xf] }
 0x348   : > { %4361 = vmatpush1.msk.msra.mxu1 %vm513_vm0, %v2226_v58  ;;  %2299 = vmatprep.mubr.f32.mxu1 %v4813_v1  ;;  %v486_v1 = vld [vmem:[%s5802_s5 + $0x20] sm:$0xf]  ;;  %v2939_v58 = vmul.f32 %v5057_v61, %v2933_v41 }
 0x349   : > { %4363 = vmatprep.subr.msk.mxu1 %vm513_vm0, %v2321_v60 }
 0x34d   : > { %v2405_v9 = vpop.permute.xlu0 %2404 }
 0x34f   : > { %4362 = vmatmul.mubr.msk.f32.vlgmr.msra.gmra.mrb[0].mxu1 %vm1590_vm14, %v485_v4 }
 0x350   : > { %4364 = vmatpush1.msk.msra.mxu1 %vm513_vm0, %v2320_v5  ;;  %2393 = vmatprep.mubr.f32.mxu1 %v5375_v6  ;;  %v3050_v5 = vmul.f32 %v2934_v49, %v5074_v56  ;;  %vm2449_vm0 = vcmask 97280  }
 0x357   : > { %4365 = vmatmul.mubr.msk.f32.vlgmr.msra.gmra.mrb[0].mxu1 %vm1590_vm14, %v486_v1  ;;  %v3051_v1 = vmul.f32 %v5051_v55, %v2935_v54 }
 0x358   : > { %3479 = vmatprep.mubr.f32.mxu1 %v5375_v6 }
 0x42a   : > { %v2395_v10 = vpop.f32.mrb[0].mxu1 }
 0x42b   : > { %v2407_v12 = vadd.f32 %v2405_v9, %v2395_v10  ;;  %v2397_v13 = vpop.f32.mrb[1].mxu1  ;;  %v5453_v10 = vmul.f32 %v5375_v6, %v4994_v8 }
 0x42c   : > { %v2408_v16 = vadd.f32 %v2405_v9, %v2397_v13  ;;  %v4686_v13 = vpack.i.bf16 %v3051_v1, %v3050_v5 }
 0x42d   : > { %v2409_v18 = vmax.f32 %v2407_v12, 0.0  ;;  %v2743_v12 = vmul.f32 %v4994_v8, %v5286_v42 }
 0x42e   : > { %v2410_v22 = vmax.f32 %v2408_v16, 0.0 }
 0x42f   : > { %2411 = vst [vmem:[#allocation2 + $0x8] sm:$0xf] %v2409_v18  ;;  %v4666_v16 = vpack.i.bf16 %v2743_v12, %v5453_v10  ;;  %v2940_v18 = vmul.f32 %v2934_v49, %v5083_v17 }
 0x430   : > { %2412 = vst [vmem:[#allocation2 + $0x10] sm:$0xf] %v2410_v22  ;;  %v2941_v22 = vmul.f32 %v5038_v34, %v2935_v54  ;;  %v3264_v34 = vmul.f32 %v2934_v49, %v5125_v59 }
 0x436   : > { %v5387_v45 = vld [vmem:[#allocation2 + $0x8] sm:$0xff] }
 0x437   : > { %v5389_v26 = vld [vmem:[#allocation2 + $0x10] sm:$0xff]  ;;  %v2631_v27 = vmul.f32 %v5387_v45, %v5028_v25  ;;  %3383 = vst [vmem:[#allocation2 + $0x8] sm:$0xf] %v3379_v24  ;;  %v2420_v31 = vmul.f32 %v5387_v45, %v4976_v50  ;;  %v2936_v53 = vmul.f32 %v5057_v61, %v5387_v45  ;;  %v2741_v60 = vmul.f32 %v5387_v45, %v5018_v19 }
 0x438   : > { %v4611_v28 = vpack.i.bf16 %v5389_v26, %v5387_v45  ;;  %v2632_v15 = vmul.f32 %v4984_v62, %v5389_v26  ;;  %3384 = vst [vmem:[#allocation2 + $0x10] sm:$0xf] %v3381_v44  ;;  %v2421_v32 = vmul.f32 %v4969_v46, %v5389_v26  ;;  %v2937_v39 = vmul.f32 %v5389_v26, %v5083_v17 }
 0x439   : > { %v2742_v0 = vmul.f32 %v4992_v7, %v5389_v26  ;;  %v4681_v4 = vpack.i.bf16 %v2939_v58, %v2936_v53  ;;  %v4701_v24 = vpack.i.bf16 %v5375_v6, %v5389_v26  ;;  %v4671_v44 = vpack.i.bf16 %v2941_v22, %v2940_v18 }
 0x43a   : > { %4612 = vrot.lane.b32.xlu1 %v4611_v28, %s5823_s15  ;;  %v4646_v2 = vpack.i.bf16 %v2632_v15, %v2631_v27  ;;  %v4631_v11 = vpack.i.bf16 %v2421_v32, %v2420_v31  ;;  %v4676_v48 = vpack.i.bf16 %v5431_v23, %v2937_v39  ;;  %v3047_v8 = vmul.f32 %v5389_v26, %v5074_v56  ;;  %v497_v31 = vld [vmem:[%s5805_s8] sm:$0xf]  ;;  %v4623_v39 = vpop.permute.xlu0 %4622 }
 0x43b   : > { %v4661_v9 = vpack.i.bf16 %v2742_v0, %v2741_v60  ;;  %v4711_v42 = vpack.i.bf16 %v2933_v41, %v5387_v45  ;;  %v5472_v27 = vmul.f32 %v5375_v6, %v5051_v55  ;;  %v3265_v28 = vmul.f32 %v5105_v37, %v2935_v54 }
 0x43c   : > { %4647 = vrot.lane.b32.xlu0 %v4646_v2, %s5832_s30  ;;  %v3046_v2 = vmul.f32 %v5053_v57, %v5387_v45  ;;  %v4706_v32 = vpack.i.bf16 %v2935_v54, %v2934_v49  ;;  %v4625_v47 = vunpack.i.h.bf16 %v4623_v39 }
 0x43d   : > { %v4691_v15 = vpack.i.bf16 %v5472_v27, %v3047_v8  ;;  %v4716_v3 = vpack.i.bf16 %v3265_v28, %v3264_v34 }
 0x43e   : > { %4617 = vrot.lane.b32.xlu1 %v4616_v30, %s5823_s15  ;;  %v3049_v30 = vmul.f32 %v5053_v57, %v2933_v41 }
 0x440   : > { %4652 = vrot.lane.b32.xlu0 %v4651_v35, %s5832_s30  ;;  %v4696_v55 = vpack.i.bf16 %v3049_v30, %v3046_v2  ;;  %v3261_v35 = vmul.f32 %v5389_v26, %v5125_v59 }
 0x442   : > { %4632 = vrot.lane.b32.xlu1 %v4631_v11, %s5833_s12  ;;  %v4721_v14 = vpack.i.bf16 %v5492_v36, %v3261_v35  ;;  %v3260_v11 = vmul.f32 %v5107_v38, %v5387_v45 }
 0x444   : > { %4657 = vrot.lane.b32.xlu0 %v4656_v63, %s5834_s29  ;;  %v4726_v63 = vpack.i.bf16 %v3263_v33, %v3260_v11 }
 0x446   : > { %4637 = vrot.lane.b32.xlu1 %v4636_v20, %s5833_s12  ;;  %v4628_v20 = vpop.permute.xlu0 %4627 }
 0x447   : > { %v4630_v60 = vunpack.i.h.bf16 %v4628_v20  ;;  %v4629_v0 = vunpack.i.l.bf16 %v4628_v20 }
 0x448   : > { %4677 = vrot.lane.b32.xlu0 %v4676_v48, %s5828_s25  ;;  %v4624_v48 = vunpack.i.l.bf16 %v4623_v39 }
 0x44a   : > { %4642 = vrot.lane.b32.xlu1 %v4641_v51, %s5832_s30 }
 0x44c   : > { %4682 = vrot.lane.b32.xlu0 %v4681_v4, %s5828_s25 }
 0x44e   : > { %4662 = vrot.lane.b32.xlu1 %v4661_v9, %s5834_s29 }
 0x450   : > { %4687 = vrot.lane.b32.xlu0 %v4686_v13, %s5829_s14 }
 0x452   : > { %4667 = vrot.lane.b32.xlu1 %v4666_v16, %s5834_s29 }
 0x454   : > { %4702 = vrot.lane.b32.xlu0 %v4701_v24, %s5830_s16 }
 0x456   : > { %4672 = vrot.lane.b32.xlu1 %v4671_v44, %s5828_s25  ;;  %v2549_v44 = vsel %vm700_vm10, %v4629_v0, %v4630_v60 }
 0x458   : > { %4712 = vrot.lane.b32.xlu0 %v4711_v42, %s5830_s16  ;;  %v489_v42 = vld [vmem:[%s5804_s7 + $0x4] sm:$0xf] }
 0x45a   : > { %4692 = vrot.lane.b32.xlu1 %v4691_v15, %s5829_s14 }
 0x45c   : > { %4717 = vrot.lane.b32.xlu0 %v4716_v3, %s5835_s22 }
 0x45e   : > { %4697 = vrot.lane.b32.xlu1 %v4696_v55, %s5829_s14 }
 0x460   : > { %3372 = vperm.xlu0 %4610, %v497_v31  }
 0x462   : > { %4707 = vrot.lane.b32.xlu1 %v4706_v32, %s5830_s16 }
 0x466   : > { %4722 = vrot.lane.b32.xlu1 %v4721_v14, %s5835_s22 }
 0x46a   : > { %4727 = vrot.lane.b32.xlu1 %v4726_v63, %s5835_s22 }
 0x4ac   : > { %v4613_v40 = vpop.permute.xlu1 %4612 }
 0x4ad   : > { %v4615_v53 = vunpack.i.h.bf16 %v4613_v40  ;;  %v4614_v37 = vunpack.i.l.bf16 %v4613_v40 }
 0x4ae   : > { %v4648_v49 = vpop.permute.xlu0 %4647 }
 0x4af   : > { %v2443_v4 = vsel %vm599_vm11, %v4624_v48, %v4614_v37  ;;  %v2444_v41 = vsel %vm599_vm11, %v4614_v37, %v4615_v53  ;;  %v4650_v3 = vunpack.i.h.bf16 %v4648_v49  ;;  %v4649_v30 = vunpack.i.l.bf16 %v4648_v49  ;;  %v488_v49 = vld [vmem:[%s5804_s7] sm:$0xf] }
 0x4b0   : > { %v4618_v54 = vpop.permute.xlu1 %4617 }
 0x4b1   : > { %v4620_v51 = vunpack.i.h.bf16 %v4618_v54  ;;  %v4619_v58 = vunpack.i.l.bf16 %v4618_v54  ;;  %v2655_v20 = vsel %vm817_vm8, %v4649_v30, %v4650_v3 }
 0x4b2   : > { %v4653_v24 = vpop.permute.xlu0 %4652 }
 0x4b3   : > { %v2445_v5 = vsel %vm599_vm11, %v4625_v47, %v4619_v58  ;;  %v2446_v1 = vsel %vm599_vm11, %v4619_v58, %v4620_v51  ;;  %v4654_v55 = vunpack.i.l.bf16 %v4653_v24  ;;  %v4655_v33 = vunpack.i.h.bf16 %v4653_v24  ;;  %v490_v24 = vld [vmem:[%s5804_s7 + $0x8] sm:$0xf] }
 0x4b4   : > { %v4411_v12 = vpack.c.bf16 %v2446_v1, %v2444_v41  ;;  %v4414_v13 = vpack.c.bf16 %v2445_v5, %v2443_v4  ;;  %v4633_v16 = vpop.permute.xlu1 %4632 }
 0x4b5   : > { %v4635_v18 = vunpack.i.h.bf16 %v4633_v16  ;;  %v4634_v22 = vunpack.i.l.bf16 %v4633_v16  ;;  %v2654_v40 = vsel %vm817_vm8, %v4654_v55, %v4649_v30 }
 0x4b6   : > { %4413 = vmatprep.subr.msk.bf16.mxu0 %vm5505_vm1, %v4411_v12  ;;  %v4658_v35 = vpop.permute.xlu0 %4657 }
 0x4b7   : > { %v2547_v8 = vsel %vm700_vm10, %v4634_v22, %v4635_v18  ;;  %4416 = vmatpush1.bf16.msk.msra.mxu0 %vm5505_vm1, %v4414_v13  ;;  %v4660_v47 = vunpack.i.h.bf16 %v4658_v35  ;;  %v4659_v48 = vunpack.i.l.bf16 %v4658_v35 }
 0x4b8   : > { %v4417_v34 = vpack.c.bf16 %v2549_v44, %v2547_v8  ;;  %v4638_v28 = vpop.permute.xlu1 %4637 }
 0x4b9   : > { %v4640_v15 = vunpack.i.h.bf16 %v4638_v28  ;;  %v4639_v2 = vunpack.i.l.bf16 %v4638_v28  ;;  %v2767_v4 = vsel %vm934_vm9, %v4659_v48, %v4660_v47 }
 0x4ba   : > { %4368 = vmatmul.mubr.msk.f32.vlgmr.msra.gmra.mrb[2].mxu0 %vm2449_vm0, %v489_v42  ;;  %4419 = vmatprep.subr.msk.bf16.mxu0 %vm5505_vm1, %v4417_v34  ;;  %v4678_v5 = vpop.permute.xlu0 %4677  ;;  %v4435_v34 = vpack.c.bf16 %v5290_v52, %v5389_v26 }
 0x4bb   : > { %v2546_v31 = vsel %vm700_vm10, %v4639_v2, %v4634_v22  ;;  %v2548_v32 = vsel %vm700_vm10, %v4640_v15, %v4629_v0  ;;  %2623 = vmatprep.mubr.f32.mxu0 %v5375_v6  ;;  %v4680_v3 = vunpack.i.h.bf16 %v4678_v5  ;;  %v4679_v30 = vunpack.i.l.bf16 %v4678_v5 }
 0x4bc   : > { %v4420_v14 = vpack.c.bf16 %v2548_v32, %v2546_v31  ;;  %v4643_v11 = vpop.permute.xlu1 %4642  ;;  %v491_v31 = vld [vmem:[%s5804_s7 + $0xc] sm:$0xf]  ;;  %v4438_v32 = vpack.c.bf16 %v5288_v43, %v5387_v45 }
 0x4bd   : > { %v4645_v63 = vunpack.i.h.bf16 %v4643_v11  ;;  %v4644_v39 = vunpack.i.l.bf16 %v4643_v11  ;;  %v2961_v26 = vsel %vm902_vm6, %v4679_v30, %v4680_v3 }
 0x4be   : > { %4422 = vmatpush1.bf16.msk.msra.mxu0 %vm5505_vm1, %v4420_v14  ;;  %v4683_v42 = vpop.permute.xlu0 %4682 }
 0x4bf   : > { %v2656_v53 = vsel %vm817_vm8, %v4655_v33, %v4644_v39  ;;  %v2657_v37 = vsel %vm817_vm8, %v4644_v39, %v4645_v63  ;;  %v4685_v63 = vunpack.i.h.bf16 %v4683_v42  ;;  %v4684_v39 = vunpack.i.l.bf16 %v4683_v42 }
 0x4c0   : > { %v4423_v54 = vpack.c.bf16 %v2657_v37, %v2655_v20  ;;  %v4426_v51 = vpack.c.bf16 %v2656_v53, %v2654_v40  ;;  %v4663_v58 = vpop.permute.xlu1 %4662 }
 0x4c1   : > { %v4665_v60 = vunpack.i.h.bf16 %v4663_v58  ;;  %v4664_v0 = vunpack.i.l.bf16 %v4663_v58  ;;  %v2960_v53 = vsel %vm902_vm6, %v4684_v39, %v4679_v30 }
 0x4c2   : > { %4371 = vmatmul.mubr.msk.f32.vlgmr.msra.gmra.mrb[2].mxu0 %vm2449_vm0, %v488_v49  ;;  %4425 = vmatprep.subr.msk.bf16.mxu0 %vm5505_vm1, %v4423_v54  ;;  %v4688_v52 = vpop.permute.xlu0 %4687 }
 0x4c3   : > { %v2765_v41 = vsel %vm934_vm9, %v4664_v0, %v4665_v60  ;;  %4428 = vmatpush1.bf16.msk.msra.mxu0 %vm5505_vm1, %v4426_v51  ;;  %2731 = vmatprep.mubr.f32.mxu0 %v5375_v6  ;;  %v4690_v20 = vunpack.i.h.bf16 %v4688_v52  ;;  %v4689_v40 = vunpack.i.l.bf16 %v4688_v52 }
 0x4c4   : > { %v4429_v1 = vpack.c.bf16 %v2767_v4, %v2765_v41  ;;  %v4668_v12 = vpop.permute.xlu1 %4667 }
 0x4c5   : > { %v4670_v13 = vunpack.i.h.bf16 %v4668_v12  ;;  %v4669_v16 = vunpack.i.l.bf16 %v4668_v12  ;;  %v3073_v49 = vsel %vm785_vm7, %v4689_v40, %v4690_v20 }
 0x4c6   : > { %4431 = vmatprep.subr.msk.bf16.mxu0 %vm5505_vm1, %v4429_v1  ;;  %v4703_v47 = vpop.permute.xlu0 %4702 }
 0x4c7   : > { %v2764_v18 = vsel %vm934_vm9, %v4669_v16, %v4664_v0  ;;  %v2766_v22 = vsel %vm934_vm9, %v4670_v13, %v4659_v48  ;;  %v492_v48 = vld [vmem:[%s5804_s7 + $0x10] sm:$0xf]  ;;  %v4705_v5 = vunpack.i.h.bf16 %v4703_v47  ;;  %v4704_v1 = vunpack.i.l.bf16 %v4703_v47 }
 0x4c8   : > { %v4432_v44 = vpack.c.bf16 %v2766_v22, %v2764_v18  ;;  %v4673_v8 = vpop.permute.xlu1 %4672  ;;  %v493_v18 = vld [vmem:[%s5804_s7 + $0x14] sm:$0xf] }
 0x4c9   : > { %v4675_v28 = vunpack.i.h.bf16 %v4673_v8  ;;  %v4674_v15 = vunpack.i.l.bf16 %v4673_v8 }
 0x4ca   : > { %4374 = vmatmul.mubr.msk.f32.vlgmr.msra.gmra.mrb[2].mxu0 %vm2449_vm0, %v490_v24  ;;  %v4713_v41 = vpop.permute.xlu0 %4712  ;;  %v3175_v24 = vsel %vm1350_vm13, %v4704_v1, %v4705_v5 }
 0x4cb   : > { %4434 = vmatpush1.bf16.msk.msra.mxu0 %vm5505_vm1, %v4432_v44  ;;  %2841 = vmatprep.mubr.f32.mxu0 %v5375_v6  ;;  %v2963_v55 = vsel %vm902_vm6, %v4674_v15, %v4675_v28  ;;  %v2962_v43 = vsel %vm902_vm6, %v4685_v63, %v4674_v15  ;;  %v4715_v15 = vunpack.i.h.bf16 %v4713_v41 }
 0x4cc   : > { %4437 = vmatprep.subr.msk.bf16.mxu0 %vm5505_vm1, %v4435_v34  ;;  %v4693_v2 = vpop.permute.xlu1 %4692  ;;  %v4441_v35 = vpack.c.bf16 %v2963_v55, %v2961_v26  ;;  %v4444_v54 = vpack.c.bf16 %v2962_v43, %v2960_v53  ;;  %v494_v26 = vld [vmem:[%s5804_s7 + $0x18] sm:$0xf]  ;;  %v496_v43 = vld [vmem:[%s5804_s7 + $0x20] sm:$0xf] }
 0x4cd   : > { %v4695_v11 = vunpack.i.h.bf16 %v4693_v2  ;;  %v4694_v33 = vunpack.i.l.bf16 %v4693_v2  ;;  %v4714_v2 = vunpack.i.l.bf16 %v4713_v41 }
 0x4ce   : > { %v4718_v8 = vpop.permute.xlu0 %4717 }
 0x4cf   : > { %v3071_v45 = vsel %vm785_vm7, %v4694_v33, %v4695_v11  ;;  %v4720_v3 = vunpack.i.h.bf16 %v4718_v8  ;;  %v4719_v30 = vunpack.i.l.bf16 %v4718_v8 }
 0x4d0   : > { %v4698_v14 = vpop.permute.xlu1 %4697  ;;  %v4447_v51 = vpack.c.bf16 %v3073_v49, %v3071_v45 }
 0x4d1   : > { %v4700_v58 = vunpack.i.h.bf16 %v4698_v14  ;;  %v4699_v60 = vunpack.i.l.bf16 %v4698_v14 }
 0x4d2   : > { %4377 = vmatmul.mubr.msk.f32.vlgmr.msra.gmra.mrb[2].mxu0 %vm2449_vm0, %v491_v31 }
 0x4d3   : > { %4440 = vmatpush1.bf16.msk.msra.mxu0 %vm5505_vm1, %v4438_v32  ;;  %2921 = vmatprep.mubr.f32.mxu0 %v5375_v6  ;;  %v3070_v12 = vsel %vm785_vm7, %v4699_v60, %v4694_v33  ;;  %v3072_v13 = vsel %vm785_vm7, %v4700_v58, %v4689_v40  ;;  %v3174_v32 = vsel %vm1350_vm13, %v4714_v2, %v4704_v1  ;;  %v495_v40 = vld [vmem:[%s5804_s7 + $0x1c] sm:$0xf] }
 0x4d4   : > { %4443 = vmatprep.subr.msk.bf16.mxu0 %vm5505_vm1, %v4441_v35  ;;  %v4708_v37 = vpop.permute.xlu1 %4707  ;;  %v4450_v44 = vpack.c.bf16 %v3072_v13, %v3070_v12  ;;  %v3287_v35 = vsel %vm567_vm5, %v4719_v30, %v4720_v3 }
 0x4d5   : > { %v4710_v0 = vunpack.i.h.bf16 %v4708_v37  ;;  %v4709_v4 = vunpack.i.l.bf16 %v4708_v37 }
 0x4d7   : > { %v3177_v16 = vsel %vm1350_vm13, %v4709_v4, %v4710_v0  ;;  %v3176_v55 = vsel %vm1350_vm13, %v4715_v15, %v4709_v4 }
 0x4d8   : > { %v4723_v22 = vpop.permute.xlu1 %4722  ;;  %v4453_v42 = vpack.c.bf16 %v3177_v16, %v3175_v24  ;;  %v4456_v14 = vpack.c.bf16 %v3176_v55, %v3174_v32 }
 0x4d9   : > { %v4725_v34 = vunpack.i.h.bf16 %v4723_v22  ;;  %v4724_v28 = vunpack.i.l.bf16 %v4723_v22 }
 0x4da   : > { %4380 = vmatmul.mubr.msk.f32.vlgmr.msra.gmra.mrb[2].mxu0 %vm2449_vm0, %v492_v48 }
 0x4db   : > { %4446 = vmatpush1.bf16.msk.msra.mxu0 %vm5505_vm1, %v4444_v54  ;;  %3037 = vmatprep.mubr.f32.mxu0 %v5375_v6  ;;  %v3285_v31 = vsel %vm567_vm5, %v4724_v28, %v4725_v34 }
 0x4dc   : > { %4449 = vmatprep.subr.msk.bf16.mxu0 %vm5505_vm1, %v4447_v51  ;;  %v4728_v52 = vpop.permute.xlu1 %4727  ;;  %v4459_v11 = vpack.c.bf16 %v3287_v35, %v3285_v31  ;;  %v501_v31 = vld [vmem:[%s5806_s9 + $0xc] sm:$0xf] }
 0x4dd   : > { %v4730_v33 = vunpack.i.h.bf16 %v4728_v52  ;;  %v4729_v63 = vunpack.i.l.bf16 %v4728_v52 }
 0x4df   : > { %v3284_v39 = vsel %vm567_vm5, %v4729_v63, %v4724_v28  ;;  %v3286_v20 = vsel %vm567_vm5, %v4730_v33, %v4719_v30  ;;  %v3373_v45 = vpop.permute.xlu0 %3372  ;;  %v500_v28 = vld [vmem:[%s5806_s9 + $0x8] sm:$0xf] }
 0x4e0   : > { %v4462_v47 = vpack.c.bf16 %v3286_v20, %v3284_v39  ;;  %v503_v20 = vld [vmem:[%s5806_s9 + $0x14] sm:$0xf] }
 0x4e2   : > { %4383 = vmatmul.mubr.msk.f32.vlgmr.msra.gmra.mrb[2].mxu0 %vm2449_vm0, %v493_v18  ;;  %v498_v18 = vld [vmem:[%s5806_s9] sm:$0xf] }
 0x4e3   : > { %4452 = vmatpush1.bf16.msk.msra.mxu0 %vm5505_vm1, %v4450_v44  ;;  %3147 = vmatprep.mubr.f32.mxu0 %v5375_v6 }
 0x4e4   : > { %4455 = vmatprep.subr.msk.bf16.mxu0 %vm5505_vm1, %v4453_v42 }
 0x4ea   : > { %4386 = vmatmul.mubr.msk.f32.vlgmr.msra.gmra.mrb[2].mxu0 %vm2449_vm0, %v494_v26 }
 0x4eb   : > { %4458 = vmatpush1.bf16.msk.msra.mxu0 %vm5505_vm1, %v4456_v14  ;;  %3251 = vmatprep.mubr.f32.mxu0 %v5375_v6  ;;  %v502_v14 = vld [vmem:[%s5806_s9 + $0x10] sm:$0xf] }
 0x4ec   : > { %4461 = vmatprep.subr.msk.bf16.mxu0 %vm5505_vm1, %v4459_v11 }
 0x4f2   : > { %4389 = vmatmul.mubr.msk.f32.vlgmr.msra.gmra.mrb[2].mxu0 %vm2449_vm0, %v495_v40 }
 0x4f3   : > { %4464 = vmatpush1.bf16.msk.msra.mxu0 %vm5505_vm1, %v4462_v47  ;;  %3361 = vmatprep.mubr.f32.mxu0 %v5375_v6 }
 0x4fa   : > { %4392 = vmatmul.mubr.msk.f32.vlgmr.msra.gmra.mrb[2].mxu0 %vm2449_vm0, %v496_v43 }
 0x5cd   : > { %v3363_v48 = vpop.f32.mrb[2].mxu0 }
 0x5ce   : > { %v3375_v53 = vadd.f32 %v3373_v45, %v3363_v48  ;;  %v3365_v37 = vpop.f32.mrb[3].mxu0  ;;  %v504_v48 = vld [vmem:[%s5806_s9 + $0x18] sm:$0xf] }
 0x5cf   : > { %v3376_v49 = vadd.f32 %v3373_v45, %v3365_v37 }
 0x5d0   : > { %v3377_v54 = vmax.f32 %v3375_v53, 0.0 }
 0x5d1   : > { %v3378_v51 = vmax.f32 %v3376_v49, 0.0 }
 0x5d2   : > { %v3387_v58 = vrot.slane %v3377_v54, 4 }
 0x5d3   : > { %v3388_v60 = vrot.slane %v3378_v51, 4 }
 0x5d4   : > { %3391 = vst [vmem:[#allocation2 + $0x8] sm:$0xf0] %v3387_v58  ;;  %v505_v58 = vld [vmem:[%s5806_s9 + $0x1c] sm:$0xf] }
 0x5d5   : > { %3392 = vst [vmem:[#allocation2 + $0x10] sm:$0xf0] %v3388_v60 }
 0x5db   : > { %v5621_v9 = vld [vmem:[#allocation2 + $0x8] sm:$0xff] }
 0x5dc   : > { %3404 = vrot.lane.b32.xlu1 %v5621_v9, %s5838_s24  ;;  %v5625_v0 = vld [vmem:[#allocation2 + $0x10] sm:$0xff]  ;;  %v3397_v4 = vmul.f32 %v5621_v9, %v4976_v50  ;;  %v3574_v5 = vmul.f32 %v5621_v9, %v5028_v25  ;;  %v3666_v50 = vmul.f32 %v5621_v9, %v5018_v19  ;;  %v3836_v19 = vmul.f32 %v5057_v61, %v5621_v9 }
 0x5dd   : > { %3406 = vrot.lane.b32.xlu0 %v5625_v0, %s5838_s24  ;;  %v3398_v41 = vmul.f32 %v4969_v46, %v5625_v0  ;;  %v3575_v1 = vmul.f32 %v4984_v62, %v5625_v0  ;;  %v3667_v46 = vmul.f32 %v4992_v7, %v5625_v0  ;;  %v3837_v62 = vmul.f32 %v5625_v0, %v5083_v17 }
 0x5de   : > { %v3929_v25 = vmul.f32 %v5625_v0, %v5074_v56  ;;  %v3928_v7 = vmul.f32 %v5053_v57, %v5621_v9  ;;  %v4110_v61 = vmul.f32 %v5625_v0, %v5125_v59  ;;  %v4109_v57 = vmul.f32 %v5107_v38, %v5621_v9  ;;  %v507_v56 = vld [vmem:[%s5807_s10] sm:$0xf]  ;;  %v499_v38 = vld [vmem:[%s5806_s9 + $0x4] sm:$0xf] }
 0x5e0   : > { %3402 = vrot.lane.b32.xlu1 %v5375_v6, %s5838_s24  ;;  %s4317_s24 = sshll.u32 %s407_s13, 3 }
 0x5e1   : > { %3491 = vrot.lane.b32.xlu0 %v3397_v4, %s5833_s12  ;;  %s409_s15 = scalar_lea.vmem [#allocation3], %s4317_s24 }
 0x5e4   : > { %3493 = vrot.lane.b32.xlu1 %v3398_v41, %s5833_s12 }
 0x5e5   : > { %3489 = vrot.lane.b32.xlu0 %v5420_v21, %s5833_s12  ;;  %s4216_s12 = scalar_lea.sflag [#allocation4], %s407_s13 }
 0x5e8   : > { %3581 = vrot.lane.b32.xlu1 %v3574_v5, %s5832_s30 }
 0x5e9   : > { %3583 = vrot.lane.b32.xlu0 %v3575_v1, %s5832_s30 }
 0x5ec   : > { %3579 = vrot.lane.b32.xlu1 %v5400_v29, %s5832_s30  ;;  %s5755_s30 = scalar_lea.hbm %s5808_s11, %s4410_s0 }
 0x5ed   : > { %3673 = vrot.lane.b32.xlu0 %v3666_v50, %s5834_s29 }
 0x5f0   : > { %3675 = vrot.lane.b32.xlu1 %v3667_v46, %s5834_s29 }
 0x5f1   : > { %3671 = vrot.lane.b32.xlu0 %v5453_v10, %s5834_s29 }
 0x5f4   : > { %3844 = vrot.lane.b32.xlu1 %v3837_v62, %s5828_s25 }
 0x5f5   : > { %3846 = vrot.lane.b32.xlu0 %v5431_v23, %s5828_s25 }
 0x5f8   : > { %3842 = vrot.lane.b32.xlu1 %v3836_v19, %s5828_s25  ;;  %s4230_s25 = sshll.u32 %s409_s15, 4  ;;  %s5757_s25 = int_to_ptr.vmem [resolvable:$true] %s4230_s25 }
 0x5f9   : > { %3936 = vrot.lane.b32.xlu0 %v3929_v25, %s5829_s14  ;;  %s4749_s29 = scalar_lea.vmem %s5757_s25, 128 }
 0x5fa   : > { %p4750_p11 = scmp.ne.s32.totalorder %s5757_s25, %s4749_s29 }
 0x5fc   : > { %3938 = vrot.lane.b32.xlu1 %v5472_v27, %s5829_s14  ;;  %p4751_p12 = pnand %p4750_p11, %p4923_p5 }
 0x5fd   : > { %3934 = vrot.lane.b32.xlu0 %v3928_v7, %s5829_s14 }
 0x5fe   : > { %p4752_p13 = pneg %p4751_p12 }
 0x600   : > { %4025 = vrot.lane.b32.xlu1 %v5625_v0, %s5830_s16 }
 0x601   : > { %4027 = vrot.lane.b32.xlu0 %v5375_v6, %s5830_s16 }
 0x604   : > { %4023 = vrot.lane.b32.xlu1 %v5621_v9, %s5830_s16 }
 0x605   : > { %4117 = vrot.lane.b32.xlu0 %v4110_v61, %s5835_s22 }
 0x608   : > { %4119 = vrot.lane.b32.xlu1 %v5492_v36, %s5835_s22 }
 0x609   : > { %4115 = vrot.lane.b32.xlu0 %v4109_v57, %s5835_s22  ;;  %s4753_s22 = sshll.u32 %s4824_s21, 4  ;;  %s4754_s22 = int_to_ptr.vmem [resolvable:$false] %s4753_s22 }
 0x60a   : > { %s4755_s24 = scalar_lea.vmem %s4754_s22, 256  ;;  %p4756_p0 = scmp.lt.s32.totalorder %s5757_s25, %s4754_s22 }
 0x60b   : > { %p4757_p1 = scmp.lt.s32.totalorder %s4755_s24, %s4749_s29 }
 0x60c   : > { %4203 = vperm.xlu1 %4609, %v507_v56  }
 0x60d   : > { %p4758_p2 = por %p4757_p1, %p4756_p0 }
 0x60f   : > { %p4759_p3 = pnand %p4758_p2, %p4752_p13 }
 0x64e   : > { %v3405_v17 = vpop.permute.xlu1 %3404 }
 0x64f   : > { %v3407_v59 = vpop.permute.xlu0 %3406 }
 0x650   : > { %v3409_v29 = vsel %vm599_vm11, %v3405_v17, %v3407_v59 }
 0x651   : > { %3415 = vmatprep.subr.mxu1 %v3409_v29 }
 0x652   : > { %v3403_v21 = vpop.permute.xlu1 %3402 }
 0x653   : > { %v3408_v23 = vsel %vm599_vm11, %v3403_v21, %v3405_v17  ;;  %v3492_v10 = vpop.permute.xlu0 %3491 }
 0x654   : > { %3416 = vmatpush1.msra.mxu1 %v3408_v23 }
 0x655   : > { %4393 = vmatmul.mubr.msk.f32.vlgmr.msra.gmra.mrb[2].mxu1 %vm604_vm12, %v499_v38 }
 0x656   : > { %v3494_v27 = vpop.permute.xlu1 %3493  ;;  %3566 = vmatprep.mubr.f32.mxu1 %v5375_v6 }
 0x657   : > { %v3490_v36 = vpop.permute.xlu0 %3489  ;;  %v3496_v12 = vsel %vm700_vm10, %v3492_v10, %v3494_v27 }
 0x658   : > { %v3495_v13 = vsel %vm700_vm10, %v3490_v36, %v3492_v10  ;;  %3502 = vmatprep.subr.mxu1 %v3496_v12 }
 0x659   : > { %3503 = vmatpush1.msra.mxu1 %v3495_v13 }
 0x65a   : > { %v3582_v16 = vpop.permute.xlu1 %3581 }
 0x65b   : > { %v3584_v22 = vpop.permute.xlu0 %3583 }
 0x65c   : > { %v3586_v24 = vsel %vm817_vm8, %v3582_v16, %v3584_v22 }
 0x65d   : > { %4394 = vmatmul.mubr.msk.f32.vlgmr.msra.gmra.mrb[2].mxu1 %vm604_vm12, %v498_v18  ;;  %3592 = vmatprep.subr.mxu1 %v3586_v24 }
 0x65e   : > { %v3580_v44 = vpop.permute.xlu1 %3579  ;;  %3656 = vmatprep.mubr.f32.mxu1 %v5375_v6 }
 0x65f   : > { %v3585_v8 = vsel %vm817_vm8, %v3580_v44, %v3582_v16  ;;  %v3674_v42 = vpop.permute.xlu0 %3673 }
 0x660   : > { %3593 = vmatpush1.msra.mxu1 %v3585_v8 }
 0x662   : > { %v3676_v34 = vpop.permute.xlu1 %3675 }
 0x663   : > { %v3672_v15 = vpop.permute.xlu0 %3671  ;;  %v3678_v2 = vsel %vm934_vm9, %v3674_v42, %v3676_v34 }
 0x664   : > { %v3677_v3 = vsel %vm934_vm9, %v3672_v15, %v3674_v42  ;;  %3684 = vmatprep.subr.mxu1 %v3678_v2 }
 0x665   : > { %4395 = vmatmul.mubr.msk.f32.vlgmr.msra.gmra.mrb[2].mxu1 %vm604_vm12, %v500_v28 }
 0x666   : > { %3685 = vmatpush1.msra.mxu1 %v3677_v3  ;;  %v3845_v30 = vpop.permute.xlu1 %3844  ;;  %3748 = vmatprep.mubr.f32.mxu1 %v5375_v6 }
 0x667   : > { %3760 = vmatprep.subr.mxu1 %v5625_v0  ;;  %v3847_v55 = vpop.permute.xlu0 %3846 }
 0x668   : > { %v3849_v26 = vsel %vm902_vm6, %v3845_v30, %v3847_v55 }
 0x66a   : > { %v3843_v52 = vpop.permute.xlu1 %3842 }
 0x66b   : > { %v3937_v32 = vpop.permute.xlu0 %3936  ;;  %v3848_v11 = vsel %vm902_vm6, %v3843_v52, %v3845_v30 }
 0x66d   : > { %4396 = vmatmul.mubr.msk.f32.vlgmr.msra.gmra.mrb[2].mxu1 %vm604_vm12, %v501_v31 }
 0x66e   : > { %3761 = vmatpush1.msra.mxu1 %v5621_v9  ;;  %3824 = vmatprep.mubr.f32.mxu1 %v5375_v6  ;;  %v3939_v35 = vpop.permute.xlu1 %3938  ;;  %v506_v9 = vld [vmem:[%s5806_s9 + $0x20] sm:$0xf] }
 0x66f   : > { %3855 = vmatprep.subr.mxu1 %v3849_v26  ;;  %v3935_v33 = vpop.permute.xlu0 %3934  ;;  %v3941_v63 = vsel %vm785_vm7, %v3937_v32, %v3939_v35 }
 0x670   : > { %v3940_v47 = vsel %vm785_vm7, %v3935_v33, %v3937_v32 }
 0x672   : > { %v4026_v39 = vpop.permute.xlu1 %4025 }
 0x673   : > { %v4028_v40 = vpop.permute.xlu0 %4027 }
 0x674   : > { %v4030_v45 = vsel %vm1350_vm13, %v4026_v39, %v4028_v40 }
 0x675   : > { %4397 = vmatmul.mubr.msk.f32.vlgmr.msra.gmra.mrb[2].mxu1 %vm604_vm12, %v502_v14 }
 0x676   : > { %3856 = vmatpush1.msra.mxu1 %v3848_v11  ;;  %3919 = vmatprep.mubr.f32.mxu1 %v5375_v6  ;;  %v4024_v43 = vpop.permute.xlu1 %4023 }
 0x677   : > { %3947 = vmatprep.subr.mxu1 %v3941_v63  ;;  %v4118_v37 = vpop.permute.xlu0 %4117  ;;  %v4029_v49 = vsel %vm1350_vm13, %v4024_v43, %v4026_v39 }
 0x67a   : > { %v4120_v53 = vpop.permute.xlu1 %4119 }
 0x67b   : > { %v4122_v54 = vsel %vm567_vm5, %v4118_v37, %v4120_v53  ;;  %v4116_v51 = vpop.permute.xlu0 %4115 }
 0x67c   : > { %v4121_v60 = vsel %vm567_vm5, %v4116_v51, %v4118_v37 }
 0x67d   : > { %4398 = vmatmul.mubr.msk.f32.vlgmr.msra.gmra.mrb[2].mxu1 %vm604_vm12, %v503_v20 }
 0x67e   : > { %3948 = vmatpush1.msra.mxu1 %v3940_v47  ;;  %4011 = vmatprep.mubr.f32.mxu1 %v5375_v6 }
 0x67f   : > { %4036 = vmatprep.subr.mxu1 %v4030_v45 }
 0x685   : > { %4399 = vmatmul.mubr.msk.f32.vlgmr.msra.gmra.mrb[2].mxu1 %vm604_vm12, %v504_v48 }
 0x686   : > { %4037 = vmatpush1.msra.mxu1 %v4029_v49  ;;  %4100 = vmatprep.mubr.f32.mxu1 %v5375_v6 }
 0x687   : > { %4128 = vmatprep.subr.mxu1 %v4122_v54 }
 0x68b   : > { %v4204_v0 = vpop.permute.xlu1 %4203 }
 0x68d   : > { %4400 = vmatmul.mubr.msk.f32.vlgmr.msra.gmra.mrb[2].mxu1 %vm604_vm12, %v505_v58 }
 0x68e   : > { %4129 = vmatpush1.msra.mxu1 %v4121_v60  ;;  %4192 = vmatprep.mubr.f32.mxu1 %v5375_v6 }
 0x695   : > { %4401 = vmatmul.mubr.msk.f32.vlgmr.msra.gmra.mrb[2].mxu1 %vm604_vm12, %v506_v9 }
 0x768   : > { %v4194_v4 = vpop.f32.mrb[2].mxu1 }
 0x769   : > { %v4206_v41 = vadd.f32 %v4204_v0, %v4194_v4  ;;  %v4196_v5 = vpop.f32.mrb[3].mxu1 }
 0x76a   : > { %v4207_v1 = vadd.f32 %v4204_v0, %v4196_v5 }
 0x76b   : > { %v4208_v50 = vmax.f32 %v4206_v41, 0.0 }
 0x76c   : > { %v4209_v46 = vmax.f32 %v4207_v1, 0.0 }
 0x76e   : > { %v4212_v6 = vcombine.low %v4208_v50, %v4209_v46 }
 0x770   : > { %4214 = vst [vmem:[%s409_s15] sm:$0xff] %v4212_v6 }
 0x771   : > { %4762 = shalt.err (!%p4759_p3)
}
 0x772   : > { %s4763_s13 = scalar_lea.hbm %s5755_s30, 128  ;;  %s4767_s14 = scalar_lea.hbm %s5808_s11, 256 }
 0x773   : > { %p4764_p4 = scmp.ne.s32.totalorder %s5755_s30, %s4763_s13  ;;  %p4768_p9 = scmp.lt.u32.totalorder %s5755_s30, %s5808_s11 }
 0x774   : > { %p4769_p10 = scmp.lt.u32.totalorder %s4767_s14, %s4763_s13  ;;  %p4771_p12 = scmp.lt.u32.totalorder %s4763_s13, %s5755_s30 }
 0x775   : > { %p4765_p7 = pnand %p4764_p4, %p4923_p5 }
 0x776   : > { %p4770_p11 = por %p4769_p10, %p4768_p9 }
 0x777   : > { %p4766_p8 = pneg %p4765_p7 }
 0x778   : > { %p4772_p13 = por %p4771_p12, %p4770_p11 }
 0x77a   : > { %p4773_p0 = pnand %p4772_p13, %p4766_p8 }
 0x77c   : > { %4776 = shalt.err (!%p4773_p0)
}
 0x77d   : > { %4529 = dma.vmem_to_hbm [thread:$0]  (%p4923_p5), %s5757_s25, 128, %s5755_s30, %s4216_s12  }
 0x77e PF: > { %p4535_p1 = scmp.ge.s32.totalorder %s4811_s20, 2  ;;  %s4242_s29 = sand.u32 1, %s4799_s17  }
 0x77f   : > { %s4243_s22 = scalar_lea.sflag [#allocation4], %s4242_s29 }
 0x780   : > { %p4532_p2 = pnand %p4535_p1, %p4927_p6 }
 0x782   : > { %4794 = dma.done.wait (!%p4532_p2), %s4243_s22, 128  }
 0x783   : > { %4796 = vsyncadd (!%p4532_p2), %s4243_s22, 4294967168  ;;  %p21_p3 = scmp.ge.s32.totalorder %s4910_s23, 4   ;;  %s5839_s17 = smov %s4803_s18 }
 0x784   : > { %s5840_s18 = smov %s4807_s19  ;;  %s5841_s19 = smov %s4921_s26 }
 0x785   : > { %s5842_s20 = smov %s4910_s23  ;;  %23 = sbr.rel (!%p21_p3) target bundleno = 5 (0x5), region = 105 }
 0x78c   :  { %4248 = vsyncpa [#allocation4], 1 }
 0x78d   :  { %4250 = vsyncpa [#allocation4 + $0x1], 1 }

</bundles_post_ra>
